<compile_context>
chip_gen: v7x
topology: tpu7x:2x2x1
jax: 0.10.0
libtpu: 0.0.40
codegen_flags: <defaults>
</compile_context>

<pallas_src>
import functools
import math

import numpy as np
import jax
import jax.numpy as jnp
from jax.experimental import pallas as pl
from jax.experimental.pallas import tpu as pltpu


def _tree_sum(parts):
    """Balanced pairwise sum -> exposes ILP on the VALU slots."""
    parts = list(parts)
    while len(parts) > 1:
        nxt = [parts[i] + parts[i + 1] for i in range(0, len(parts) - 1, 2)]
        if len(parts) % 2:
            nxt.append(parts[-1])
        parts = nxt
    return parts[0]


def _decoder_layer_kernel(x_ref, cross_ref, w1_ref, w2_ref, pw_ref,
                          xo_ref, trend_ref, pad_ref, *, k_ma: int):
    f32 = jnp.float32
    bf16 = jnp.bfloat16
    Bb, L, D = x_ref.shape
    Cp = pw_ref.shape[1]
    pad = (k_ma - 1) // 2
    pf = ((pad + 7) // 8) * 8          # front padding rounded to 8 sublanes
    scale = 1.0 / math.sqrt(D)

    x = x_ref[...].astype(f32)         # (Bb, L, D)
    cross_b = cross_ref[...]           # (Bb, S, D) bf16 -- MXU operand only

    def moving_avg(z):
        # MovingAvg(kernel_size=k_ma, stride=1) with replicate padding:
        # sublane-aligned main store into the scratch, then sum k shifted
        # windows (balanced tree; prefix-sum for large k). O(k*L*D) VPU adds
        # (O(L*D) for the prefix-sum path); no MXU work.
        pad_ref[:, pf:pf + L, :] = z
        pad_ref[:, pf - pad:pf, :] = jnp.broadcast_to(z[:, 0:1, :], (Bb, pad, D))
        pad_ref[:, pf + L:pf + L + pad, :] = jnp.broadcast_to(
            z[:, L - 1:L, :], (Bb, pad, D))
        if k_ma <= 9:
            acc = _tree_sum(
                [pad_ref[:, pf - pad + j:pf - pad + j + L, :] for j in range(k_ma)])
        else:
            # Production windows (k_ma=25): O(L*D) via an exclusive prefix sum.
            zp = pad_ref[:, pf - pad:pf - pad + L + k_ma - 1, :]
            cs = jnp.concatenate(
                [jnp.zeros((Bb, 1, D), f32), jnp.cumsum(zp, axis=1)], axis=1)
            acc = cs[:, k_ma:k_ma + L, :] - cs[:, 0:L, :]
        return acc * (1.0 / k_ma)

    def attn(q, kv_b):
        # TODO(synk): the injected self/cross attention modules are realized as
        # unmasked scaled-dot-product attention (AutoCorrelation is an external
        # dependency, not part of this layer's parameters).
        qb = (q * scale).astype(bf16)      # fold 1/sqrt(D) into the small operand
        s = jnp.einsum('bqd,bkd->bqk', qb, kv_b, preferred_element_type=f32)
        s = s - jnp.max(s, axis=-1, keepdims=True)
        p = jnp.exp(s)
        p = p * pl.reciprocal(jnp.sum(p, axis=-1, keepdims=True), approx=True)
        return jnp.einsum('bqk,bkd->bqd', p.astype(bf16), kv_b,
                          preferred_element_type=f32)

    # TODO(synk): nn.Dropout(p=0.1) is identity in eval mode; omitted.

    # x = x + self_attention(x, x, x); x, _ = decomp1(x)
    x = x + attn(x, x.astype(bf16))
    x = x - moving_avg(x)

    # x = x + cross_attention(x, cross, cross); x, _ = decomp2(x)
    x = x + attn(x, cross_b)
    x = x - moving_avg(x)

    # y = conv2(relu(conv1(x))): kernel_size=1 convs == feature matmuls, fed to
    # the MXU as single 2-D matmuls with M = Bb*L rows.
    # TODO(synk): at production d_ff (~2048) tile this along FF/L with a
    # fori_loop so the f32 intermediate stays bounded in VMEM.
    x2d = x.reshape(Bb * L, D).astype(bf16)
    y = jnp.dot(x2d, w1_ref[...], preferred_element_type=f32)
    y = jnp.maximum(y, 0.0)
    y = jnp.dot(y.astype(bf16), w2_ref[...], preferred_element_type=f32)

    # x, _ = decomp3(x + y)
    x = x + y.reshape(Bb, L, D)
    x = x - moving_avg(x)
    xo_ref[...] = x.astype(xo_ref.dtype)

    # residual_trend = decomp{1,2,3}.moving_avg(x_final) summed == 3 * MA(x)
    t = 3.0 * moving_avg(x)

    # projection: Conv1d(d_model -> c_out, kernel_size=3, circular pad=1, no
    # bias). Circular-pad via the scratch, then fuse the 3 taps into ONE MXU
    # matmul with K = 3*D (taps concatenated along the feature/lane axis).
    pad_ref[:, pf:pf + L, :] = t
    pad_ref[:, pf - 1:pf, :] = t[:, L - 1:L, :]
    pad_ref[:, pf + L:pf + L + 1, :] = t[:, 0:1, :]
    taps = [pad_ref[:, pf - 1 + j:pf - 1 + j + L, :] for j in range(3)]
    if D % 128 == 0:
        lhs = jnp.concatenate(taps, axis=-1).reshape(Bb * L, 3 * D)
        trend = jnp.dot(lhs.astype(bf16), pw_ref[...], preferred_element_type=f32)
    else:
        # feature concat would be lane-unaligned: fall back to 3 K=D 2-D matmuls
        trend = _tree_sum([
            jnp.dot(t_.reshape(Bb * L, D).astype(bf16),
                    pw_ref[j * D:(j + 1) * D, :], preferred_element_type=f32)
            for j, t_ in enumerate(taps)])
    trend_ref[...] = trend.reshape(Bb, L, Cp).astype(trend_ref.dtype)


def _vmem_block_bytes(bb, L, S, D, FF, C_pad, k_ma):
    """Rough per-grid-step VMEM footprint (bytes) for a given batch block."""
    f32, bf16 = 4, 2
    pad = (k_ma - 1) // 2
    pf = ((pad + 7) // 8) * 8
    dbuf = 2 * (bb * L * D * f32            # x in  (double-buffered)
                + bb * S * D * bf16         # cross in (bf16, double-buffered)
                + bb * L * D * f32          # x out
                + bb * L * C_pad * f32)     # trend out (lane-padded)
    weights = (D * FF + FF * D + 3 * D * C_pad) * bf16   # single-buffered
    scratch = bb * (pf + L + pad) * D * f32
    live = (bb * L * FF * f32               # FFN hidden y
            + 2 * bb * L * max(L, S) * f32  # attention scores + probs
            + 6 * bb * L * D * f32          # x copies / MA windows / residuals
            + bb * L * 3 * D * f32          # fused projection LHS
            + bb * L * C_pad * f32)         # trend accumulator
    return dbuf + weights + scratch + live


def _pick_block_b(B, L, S, D, FF, C_pad, k_ma, budget_bytes=24 << 20):
    # Grid depth: >= 2 steps so v7x megacore can shard the batch axis over both
    # TensorCores, >= 4 steps (when the batch allows) so HBM<->VMEM DMAs can
    # overlap compute under software pipelining.
    if B >= 4:
        min_steps = 4
    elif B >= 2:
        min_steps = 2
    else:
        min_steps = 1
    best = 1
    for cand in range(1, B + 1):
        if B % cand:
            continue
        if B // cand < min_steps:
            continue
        if _vmem_block_bytes(cand, L, S, D, FF, C_pad, k_ma) > budget_bytes:
            continue
        best = cand
    return best


def _weight_spec(shape):
    """Grid-invariant weight: constant index_map + single-buffered pipeline."""
    index_map = lambda b: (0,) * len(shape)
    try:
        return pl.BlockSpec(shape, index_map,
                            pipeline_mode=pl.Buffered(buffer_count=1))
    except Exception:   # pipeline_mode unavailable in this JAX: default buffering
        return pl.BlockSpec(shape, index_map)


def decoder_layer_forward(x, cross, w1, w2, proj_w, k_ma, block_b=None):
    """x: (B,L,D) f32; cross: (B,S,D) f32; w1: (D,FF); w2: (FF,D);
    proj_w: (3,D,C) == torch projection weight (C,D,3) with axes (2,1,0)."""
    B, L, D = x.shape
    S = cross.shape[1]
    FF = w1.shape[1]
    C = proj_w.shape[2]
    assert k_ma >= 3 and k_ma % 2 == 1, "moving_avg kernel size must be odd >= 3"
    assert L % 8 == 0, "decoder length must be a multiple of 8"

    # Lane-dense trend store: pad c_out up to a multiple of 128 (unmasked vst),
    # un-padded after the call.
    C_pad = ((C + 127) // 128) * 128
    pw = jnp.zeros((3, D, C_pad), jnp.float32).at[:, :, :C].set(proj_w)
    pw2d = pw.reshape(3 * D, C_pad).astype(jnp.bfloat16)   # fused-tap weight (3D, Cp)

    # bf16 MXU operands; accumulation stays f32 inside the kernel. `cross` is
    # only ever consumed as an MXU operand, so it is shipped to VMEM as bf16
    # (halves its DMA bytes and its double-buffered footprint).
    w1_b = w1.astype(jnp.bfloat16)
    w2_b = w2.astype(jnp.bfloat16)
    cross_b = cross.astype(jnp.bfloat16)

    if block_b is None:
        block_b = _pick_block_b(B, L, S, D, FF, C_pad, k_ma)
    assert B % block_b == 0
    grid = (B // block_b,)

    pad = (k_ma - 1) // 2
    pf = ((pad + 7) // 8) * 8

    kernel = functools.partial(_decoder_layer_kernel, k_ma=k_ma)
    out_shape = (jax.ShapeDtypeStruct((B, L, D), jnp.float32),
                 jax.ShapeDtypeStruct((B, L, C_pad), jnp.float32))

    grid_spec = pltpu.PrefetchScalarGridSpec(
        num_scalar_prefetch=0,
        grid=grid,
        in_specs=[
            pl.BlockSpec((block_b, L, D), lambda b: (b, 0, 0)),    # x
            pl.BlockSpec((block_b, S, D), lambda b: (b, 0, 0)),    # cross (bf16)
            _weight_spec((D, FF)),                                 # conv1 weight
            _weight_spec((FF, D)),                                 # conv2 weight
            _weight_spec((3 * D, C_pad)),                          # fused proj weight
        ],
        out_specs=[
            pl.BlockSpec((block_b, L, D), lambda b: (b, 0, 0)),
            pl.BlockSpec((block_b, L, C_pad), lambda b: (b, 0, 0)),
        ],
        # replicate/circular padding scratch shared by moving_avg & projection;
        # front padding rounded to 8 sublanes so the main store is aligned.
        scratch_shapes=[pltpu.VMEM((block_b, pf + L + pad, D), jnp.float32)],
    )

    out_x, out_trend = pl.pallas_call(
        kernel,
        out_shape=out_shape,
        grid_spec=grid_spec,
        compiler_params=pltpu.CompilerParams(
            dimension_semantics=("parallel",),
            vmem_limit_bytes=32 * 1024 * 1024),
    )(x, cross_b, w1_b, w2_b, pw2d)
    # TODO(synk): on v5e, store the trend block as bf16 to halve the lane-padded
    # writeback and up-cast here if f32 is required downstream.
    return out_x, out_trend[:, :, :C]


# ----------------------------- pure-JAX reference ------------------------------

def _ref_moving_avg(x, k):
    pad = (k - 1) // 2
    front = jnp.repeat(x[:, :1, :], pad, axis=1)
    end = jnp.repeat(x[:, -1:, :], pad, axis=1)
    xp = jnp.concatenate([front, x, end], axis=1)
    L = x.shape[1]
    return sum(xp[:, i:i + L, :] for i in range(k)) / k


def _ref_attn(q, k, v):
    scale = 1.0 / math.sqrt(q.shape[-1])
    s = jnp.einsum('bld,bsd->bls', q, k) * scale
    p = jax.nn.softmax(s, axis=-1)
    return jnp.einsum('bls,bsd->bld', p, v)


def ref_forward(x, cross, w1, w2, proj_w, k_ma):
    x = x + _ref_attn(x, x, x)
    x = x - _ref_moving_avg(x, k_ma)
    x = x + _ref_attn(x, cross, cross)
    x = x - _ref_moving_avg(x, k_ma)
    y = jnp.maximum(jnp.einsum('bld,df->blf', x, w1), 0.0)
    y = jnp.einsum('blf,fd->bld', y, w2)
    x = x + y
    x = x - _ref_moving_avg(x, k_ma)
    t = 3.0 * _ref_moving_avg(x, k_ma)
    tp = jnp.concatenate([t[:, -1:, :], t, t[:, :1, :]], axis=1)   # circular pad=1
    L = x.shape[1]
    trend = sum(jnp.einsum('bld,dc->blc', tp[:, i:i + L, :], proj_w[i]) for i in range(3))
    return x, trend


if __name__ == "__main__":
    B, L, S = 2, 16, 24          # batch, decoder length, encoder (cross) length
    D, FF, C = 128, 256, 8       # d_model, d_ff, c_out (D lane-aligned -> fused proj path)
    K_MA = 5                     # moving_avg kernel size (odd, as in Autoformer)

    key = jax.random.PRNGKey(0)
    kx, kc, k1, k2, kp = jax.random.split(key, 5)
    x = jax.random.normal(kx, (B, L, D), dtype=jnp.float32)
    cross = jax.random.normal(kc, (B, S, D), dtype=jnp.float32)
    w1 = jax.random.normal(k1, (D, FF), dtype=jnp.float32) / math.sqrt(D)
    w2 = jax.random.normal(k2, (FF, D), dtype=jnp.float32) / math.sqrt(FF)
    proj_w = jax.random.normal(kp, (3, D, C), dtype=jnp.float32) / math.sqrt(3 * D)

    out_x, out_trend = decoder_layer_forward(x, cross, w1, w2, proj_w, K_MA)
    jax.block_until_ready((out_x, out_trend))

    # reference sees the same bf16-rounded weights / cross the kernel uses
    w1_r = w1.astype(jnp.bfloat16).astype(jnp.float32)
    w2_r = w2.astype(jnp.bfloat16).astype(jnp.float32)
    pw_r = proj_w.astype(jnp.bfloat16).astype(jnp.float32)
    cr_r = cross.astype(jnp.bfloat16).astype(jnp.float32)
    ref_x, ref_trend = ref_forward(x, cr_r, w1_r, w2_r, pw_r, K_MA)

    # bf16 MXU operands + approx-reciprocal softmax -> loose (but structural-
    # bug-catching) tolerance against the f32 reference.
    assert np.allclose(np.asarray(out_x), np.asarray(ref_x), atol=5e-2, rtol=5e-2)
    assert np.allclose(np.asarray(out_trend), np.asarray(ref_trend), atol=5e-2, rtol=5e-2)
    print("KERNEL_OK")
</pallas_src>

<mosaic_0001>
module attributes {stable_mosaic.version = 11 : i64} {
  func.func @_decoder_layer_kernel(%arg0: i32, %arg1: memref<1x16x128xf32, #tpu.memory_space<vmem>>, %arg2: memref<1x24x128xbf16, #tpu.memory_space<vmem>>, %arg3: memref<128x256xbf16, #tpu.memory_space<vmem>>, %arg4: memref<256x128xbf16, #tpu.memory_space<vmem>>, %arg5: memref<384x128xbf16, #tpu.memory_space<vmem>>, %arg6: memref<1x16x128xf32, #tpu.memory_space<vmem>>, %arg7: memref<1x16x128xf32, #tpu.memory_space<vmem>>, %arg8: memref<1x26x128xf32, #tpu.memory_space<vmem>>) attributes {dimension_semantics = [#tpu.dimension_semantics<parallel>], iteration_bounds = array<i64: 2>, scalar_prefetch = 0 : i64, scratch_operands = 1 : i64, tpu.core_type = #tpu.core_type<tc>, window_params = [{transform_indices = @transform_0, window_bounds = array<i64: 1, 16, 128>}, {transform_indices = @transform_1, window_bounds = array<i64: 1, 24, 128>}, {pipeline_mode = #tpu.pipeline_mode<synchronous>, transform_indices = @transform_2, window_bounds = array<i64: 128, 256>}, {pipeline_mode = #tpu.pipeline_mode<synchronous>, transform_indices = @transform_3, window_bounds = array<i64: 256, 128>}, {pipeline_mode = #tpu.pipeline_mode<synchronous>, transform_indices = @transform_4, window_bounds = array<i64: 384, 128>}, {transform_indices = @transform_5, window_bounds = array<i64: 1, 16, 128>}, {transform_indices = @transform_6, window_bounds = array<i64: 1, 16, 128>}]} {
    %c0 = arith.constant 0 : index
    %c0_0 = arith.constant 0 : index
    %c0_1 = arith.constant 0 : index
    %0 = vector.load %arg1[%c0, %c0_0, %c0_1] : memref<1x16x128xf32, #tpu.memory_space<vmem>>, vector<1x16x128xf32>
    %c0_2 = arith.constant 0 : index
    %c0_3 = arith.constant 0 : index
    %c0_4 = arith.constant 0 : index
    %1 = vector.load %arg2[%c0_2, %c0_3, %c0_4] : memref<1x24x128xbf16, #tpu.memory_space<vmem>>, vector<1x24x128xbf16>
    %2 = arith.truncf %0 : vector<1x16x128xf32> to vector<1x16x128xbf16>
    %cst = arith.constant 0.0883883461 : f32
    %3 = vector.broadcast %cst : f32 to vector<1x16x128xf32>
    %4 = arith.mulf %0, %3 : vector<1x16x128xf32>
    %5 = arith.truncf %4 : vector<1x16x128xf32> to vector<1x16x128xbf16>
    "tpu.trace_start"() <{level = 10 : i32, message = "bqd,bkd->bqk"}> : () -> ()
    %cst_5 = arith.constant dense<0.000000e+00> : vector<1x16x16xf32>
    %6 = tpu.matmul %5, %2, %cst_5 {dimension_numbers = #tpu.dot_dimension_numbers<[2], [2], [1], [1], [0, 0, 0, 1, 1, 1], [0], [0]>} : vector<1x16x128xbf16>, vector<1x16x128xbf16>, vector<1x16x16xf32> -> vector<1x16x16xf32>
    "tpu.trace_stop"() : () -> ()
    %cst_6 = arith.constant dense<0xFF800000> : vector<1x16xf32>
    %7 = vector.multi_reduction <maximumf>, %6, %cst_6 [2] : vector<1x16x16xf32> to vector<1x16xf32>
    %8 = vector.shape_cast %7 : vector<1x16xf32> to vector<1x16x1xf32>
    %9 = vector.broadcast %8 : vector<1x16x1xf32> to vector<1x16x16xf32>
    %10 = arith.subf %6, %9 : vector<1x16x16xf32>
    %11 = math.exp %10 : vector<1x16x16xf32>
    %cst_7 = arith.constant dense<0.000000e+00> : vector<1x16xf32>
    %12 = vector.multi_reduction <add>, %11, %cst_7 [2] : vector<1x16x16xf32> to vector<1x16xf32>
    %13 = vector.shape_cast %12 : vector<1x16xf32> to vector<1x16x1xf32>
    %14 = tpu.reciprocal %13 {approx = true} : vector<1x16x1xf32> -> vector<1x16x1xf32>
    %15 = vector.broadcast %14 : vector<1x16x1xf32> to vector<1x16x16xf32>
    %16 = arith.mulf %11, %15 : vector<1x16x16xf32>
    %17 = arith.truncf %16 : vector<1x16x16xf32> to vector<1x16x16xbf16>
    "tpu.trace_start"() <{level = 10 : i32, message = "bqk,bkd->bqd"}> : () -> ()
    %cst_8 = arith.constant dense<0.000000e+00> : vector<1x16x128xf32>
    %18 = tpu.matmul %17, %2, %cst_8 {dimension_numbers = #tpu.dot_dimension_numbers<[2], [1], [1], [2], [0, 0, 0, 1, 1, 2], [0], [0]>} : vector<1x16x16xbf16>, vector<1x16x128xbf16>, vector<1x16x128xf32> -> vector<1x16x128xf32>
    "tpu.trace_stop"() : () -> ()
    %19 = arith.addf %0, %18 : vector<1x16x128xf32>
    %c0_9 = arith.constant 0 : index
    %c8 = arith.constant 8 : index
    %c0_10 = arith.constant 0 : index
    %20 = vector.load %arg8[%c0_9, %c8, %c0_10] : memref<1x26x128xf32, #tpu.memory_space<vmem>>, vector<1x16x128xf32>
    tpu.vector_store %arg8[%c0_9, %c8, %c0_10], %19 {strides = array<i32>} : memref<1x26x128xf32, #tpu.memory_space<vmem>>, vector<1x16x128xf32>,
    %21 = vector.extract_strided_slice %19 {offsets = [0, 0, 0], sizes = [1, 1, 128], strides = [1, 1, 1]} : vector<1x16x128xf32> to vector<1x1x128xf32>
    %22 = vector.shape_cast %21 : vector<1x1x128xf32> to vector<1x1x128xf32>
    %23 = vector.broadcast %22 : vector<1x1x128xf32> to vector<1x2x128xf32>
    %c0_11 = arith.constant 0 : index
    %c6 = arith.constant 6 : index
    %c0_12 = arith.constant 0 : index
    %24 = vector.load %arg8[%c0_11, %c6, %c0_12] : memref<1x26x128xf32, #tpu.memory_space<vmem>>, vector<1x2x128xf32>
    tpu.vector_store %arg8[%c0_11, %c6, %c0_12], %23 {strides = array<i32>} : memref<1x26x128xf32, #tpu.memory_space<vmem>>, vector<1x2x128xf32>,
    %25 = vector.extract_strided_slice %19 {offsets = [0, 15, 0], sizes = [1, 1, 128], strides = [1, 1, 1]} : vector<1x16x128xf32> to vector<1x1x128xf32>
    %26 = vector.shape_cast %25 : vector<1x1x128xf32> to vector<1x1x128xf32>
    %27 = vector.broadcast %26 : vector<1x1x128xf32> to vector<1x2x128xf32>
    %c0_13 = arith.constant 0 : index
    %c24 = arith.constant 24 : index
    %c0_14 = arith.constant 0 : index
    %28 = vector.load %arg8[%c0_13, %c24, %c0_14] : memref<1x26x128xf32, #tpu.memory_space<vmem>>, vector<1x2x128xf32>
    tpu.vector_store %arg8[%c0_13, %c24, %c0_14], %27 {strides = array<i32>} : memref<1x26x128xf32, #tpu.memory_space<vmem>>, vector<1x2x128xf32>,
    %c0_15 = arith.constant 0 : index
    %c6_16 = arith.constant 6 : index
    %c0_17 = arith.constant 0 : index
    %29 = vector.load %arg8[%c0_15, %c6_16, %c0_17] : memref<1x26x128xf32, #tpu.memory_space<vmem>>, vector<1x16x128xf32>
    %c0_18 = arith.constant 0 : index
    %c7 = arith.constant 7 : index
    %c0_19 = arith.constant 0 : index
    %30 = vector.load %arg8[%c0_18, %c7, %c0_19] : memref<1x26x128xf32, #tpu.memory_space<vmem>>, vector<1x16x128xf32>
    %c0_20 = arith.constant 0 : index
    %c8_21 = arith.constant 8 : index
    %c0_22 = arith.constant 0 : index
    %31 = vector.load %arg8[%c0_20, %c8_21, %c0_22] : memref<1x26x128xf32, #tpu.memory_space<vmem>>, vector<1x16x128xf32>
    %c0_23 = arith.constant 0 : index
    %c9 = arith.constant 9 : index
    %c0_24 = arith.constant 0 : index
    %32 = vector.load %arg8[%c0_23, %c9, %c0_24] : memref<1x26x128xf32, #tpu.memory_space<vmem>>, vector<1x16x128xf32>
    %c0_25 = arith.constant 0 : index
    %c10 = arith.constant 10 : index
    %c0_26 = arith.constant 0 : index
    %33 = vector.load %arg8[%c0_25, %c10, %c0_26] : memref<1x26x128xf32, #tpu.memory_space<vmem>>, vector<1x16x128xf32>
    %34 = arith.addf %29, %30 : vector<1x16x128xf32>
    %35 = arith.addf %31, %32 : vector<1x16x128xf32>
    %36 = arith.addf %34, %35 : vector<1x16x128xf32>
    %37 = arith.addf %36, %33 : vector<1x16x128xf32>
    %cst_27 = arith.constant 2.000000e-01 : f32
    %38 = vector.broadcast %cst_27 : f32 to vector<1x16x128xf32>
    %39 = arith.mulf %37, %38 : vector<1x16x128xf32>
    %40 = arith.subf %19, %39 : vector<1x16x128xf32>
    %cst_28 = arith.constant 0.0883883461 : f32
    %41 = vector.broadcast %cst_28 : f32 to vector<1x16x128xf32>
    %42 = arith.mulf %40, %41 : vector<1x16x128xf32>
    %43 = arith.truncf %42 : vector<1x16x128xf32> to vector<1x16x128xbf16>
    "tpu.trace_start"() <{level = 10 : i32, message = "bqd,bkd->bqk"}> : () -> ()
    %cst_29 = arith.constant dense<0.000000e+00> : vector<1x16x24xf32>
    %44 = tpu.matmul %43, %1, %cst_29 {dimension_numbers = #tpu.dot_dimension_numbers<[2], [2], [1], [1], [0, 0, 0, 1, 1, 1], [0], [0]>} : vector<1x16x128xbf16>, vector<1x24x128xbf16>, vector<1x16x24xf32> -> vector<1x16x24xf32>
    "tpu.trace_stop"() : () -> ()
    %cst_30 = arith.constant dense<0xFF800000> : vector<1x16xf32>
    %45 = vector.multi_reduction <maximumf>, %44, %cst_30 [2] : vector<1x16x24xf32> to vector<1x16xf32>
    %46 = vector.shape_cast %45 : vector<1x16xf32> to vector<1x16x1xf32>
    %47 = vector.broadcast %46 : vector<1x16x1xf32> to vector<1x16x24xf32>
    %48 = arith.subf %44, %47 : vector<1x16x24xf32>
    %49 = math.exp %48 : vector<1x16x24xf32>
    %cst_31 = arith.constant dense<0.000000e+00> : vector<1x16xf32>
    %50 = vector.multi_reduction <add>, %49, %cst_31 [2] : vector<1x16x24xf32> to vector<1x16xf32>
    %51 = vector.shape_cast %50 : vector<1x16xf32> to vector<1x16x1xf32>
    %52 = tpu.reciprocal %51 {approx = true} : vector<1x16x1xf32> -> vector<1x16x1xf32>
    %53 = vector.broadcast %52 : vector<1x16x1xf32> to vector<1x16x24xf32>
    %54 = arith.mulf %49, %53 : vector<1x16x24xf32>
    %55 = arith.truncf %54 : vector<1x16x24xf32> to vector<1x16x24xbf16>
    "tpu.trace_start"() <{level = 10 : i32, message = "bqk,bkd->bqd"}> : () -> ()
    %cst_32 = arith.constant dense<0.000000e+00> : vector<1x16x128xf32>
    %56 = tpu.matmul %55, %1, %cst_32 {dimension_numbers = #tpu.dot_dimension_numbers<[2], [1], [1], [2], [0, 0, 0, 1, 1, 2], [0], [0]>} : vector<1x16x24xbf16>, vector<1x24x128xbf16>, vector<1x16x128xf32> -> vector<1x16x128xf32>
    "tpu.trace_stop"() : () -> ()
    %57 = arith.addf %40, %56 : vector<1x16x128xf32>
    %c0_33 = arith.constant 0 : index
    %c8_34 = arith.constant 8 : index
    %c0_35 = arith.constant 0 : index
    %58 = vector.load %arg8[%c0_33, %c8_34, %c0_35] : memref<1x26x128xf32, #tpu.memory_space<vmem>>, vector<1x16x128xf32>
    tpu.vector_store %arg8[%c0_33, %c8_34, %c0_35], %57 {strides = array<i32>} : memref<1x26x128xf32, #tpu.memory_space<vmem>>, vector<1x16x128xf32>,
    %59 = vector.extract_strided_slice %57 {offsets = [0, 0, 0], sizes = [1, 1, 128], strides = [1, 1, 1]} : vector<1x16x128xf32> to vector<1x1x128xf32>
    %60 = vector.shape_cast %59 : vector<1x1x128xf32> to vector<1x1x128xf32>
    %61 = vector.broadcast %60 : vector<1x1x128xf32> to vector<1x2x128xf32>
    %c0_36 = arith.constant 0 : index
    %c6_37 = arith.constant 6 : index
    %c0_38 = arith.constant 0 : index
    %62 = vector.load %arg8[%c0_36, %c6_37, %c0_38] : memref<1x26x128xf32, #tpu.memory_space<vmem>>, vector<1x2x128xf32>
    tpu.vector_store %arg8[%c0_36, %c6_37, %c0_38], %61 {strides = array<i32>} : memref<1x26x128xf32, #tpu.memory_space<vmem>>, vector<1x2x128xf32>,
    %63 = vector.extract_strided_slice %57 {offsets = [0, 15, 0], sizes = [1, 1, 128], strides = [1, 1, 1]} : vector<1x16x128xf32> to vector<1x1x128xf32>
    %64 = vector.shape_cast %63 : vector<1x1x128xf32> to vector<1x1x128xf32>
    %65 = vector.broadcast %64 : vector<1x1x128xf32> to vector<1x2x128xf32>
    %c0_39 = arith.constant 0 : index
    %c24_40 = arith.constant 24 : index
    %c0_41 = arith.constant 0 : index
    %66 = vector.load %arg8[%c0_39, %c24_40, %c0_41] : memref<1x26x128xf32, #tpu.memory_space<vmem>>, vector<1x2x128xf32>
    tpu.vector_store %arg8[%c0_39, %c24_40, %c0_41], %65 {strides = array<i32>} : memref<1x26x128xf32, #tpu.memory_space<vmem>>, vector<1x2x128xf32>,
    %c0_42 = arith.constant 0 : index
    %c6_43 = arith.constant 6 : index
    %c0_44 = arith.constant 0 : index
    %67 = vector.load %arg8[%c0_42, %c6_43, %c0_44] : memref<1x26x128xf32, #tpu.memory_space<vmem>>, vector<1x16x128xf32>
    %c0_45 = arith.constant 0 : index
    %c7_46 = arith.constant 7 : index
    %c0_47 = arith.constant 0 : index
    %68 = vector.load %arg8[%c0_45, %c7_46, %c0_47] : memref<1x26x128xf32, #tpu.memory_space<vmem>>, vector<1x16x128xf32>
    %c0_48 = arith.constant 0 : index
    %c8_49 = arith.constant 8 : index
    %c0_50 = arith.constant 0 : index
    %69 = vector.load %arg8[%c0_48, %c8_49, %c0_50] : memref<1x26x128xf32, #tpu.memory_space<vmem>>, vector<1x16x128xf32>
    %c0_51 = arith.constant 0 : index
    %c9_52 = arith.constant 9 : index
    %c0_53 = arith.constant 0 : index
    %70 = vector.load %arg8[%c0_51, %c9_52, %c0_53] : memref<1x26x128xf32, #tpu.memory_space<vmem>>, vector<1x16x128xf32>
    %c0_54 = arith.constant 0 : index
    %c10_55 = arith.constant 10 : index
    %c0_56 = arith.constant 0 : index
    %71 = vector.load %arg8[%c0_54, %c10_55, %c0_56] : memref<1x26x128xf32, #tpu.memory_space<vmem>>, vector<1x16x128xf32>
    %72 = arith.addf %67, %68 : vector<1x16x128xf32>
    %73 = arith.addf %69, %70 : vector<1x16x128xf32>
    %74 = arith.addf %72, %73 : vector<1x16x128xf32>
    %75 = arith.addf %74, %71 : vector<1x16x128xf32>
    %cst_57 = arith.constant 2.000000e-01 : f32
    %76 = vector.broadcast %cst_57 : f32 to vector<1x16x128xf32>
    %77 = arith.mulf %75, %76 : vector<1x16x128xf32>
    %78 = arith.subf %57, %77 : vector<1x16x128xf32>
    %79 = vector.shape_cast %78 : vector<1x16x128xf32> to vector<16x128xf32>
    %80 = arith.truncf %79 : vector<16x128xf32> to vector<16x128xbf16>
    %c0_58 = arith.constant 0 : index
    %c0_59 = arith.constant 0 : index
    %81 = vector.load %arg3[%c0_58, %c0_59] : memref<128x256xbf16, #tpu.memory_space<vmem>>, vector<128x256xbf16>
    %cst_60 = arith.constant dense<0.000000e+00> : vector<16x256xf32>
    %82 = tpu.matmul %80, %81, %cst_60 {dimension_numbers = #tpu.dot_dimension_numbers<[1], [0], [0], [1], [0, 0, 1, 1], [], []>} : vector<16x128xbf16>, vector<128x256xbf16>, vector<16x256xf32> -> vector<16x256xf32>
    %cst_61 = arith.constant 0.000000e+00 : f32
    %83 = vector.broadcast %cst_61 : f32 to vector<16x256xf32>
    %84 = arith.maximumf %82, %83 : vector<16x256xf32>
    %85 = arith.truncf %84 : vector<16x256xf32> to vector<16x256xbf16>
    %c0_62 = arith.constant 0 : index
    %c0_63 = arith.constant 0 : index
    %86 = vector.load %arg4[%c0_62, %c0_63] : memref<256x128xbf16, #tpu.memory_space<vmem>>, vector<256x128xbf16>
    %cst_64 = arith.constant dense<0.000000e+00> : vector<16x128xf32>
    %87 = tpu.matmul %85, %86, %cst_64 {dimension_numbers = #tpu.dot_dimension_numbers<[1], [0], [0], [1], [0, 0, 1, 1], [], []>} : vector<16x256xbf16>, vector<256x128xbf16>, vector<16x128xf32> -> vector<16x128xf32>
    %88 = vector.shape_cast %87 : vector<16x128xf32> to vector<1x16x128xf32>
    %89 = arith.addf %78, %88 : vector<1x16x128xf32>
    %c0_65 = arith.constant 0 : index
    %c8_66 = arith.constant 8 : index
    %c0_67 = arith.constant 0 : index
    %90 = vector.load %arg8[%c0_65, %c8_66, %c0_67] : memref<1x26x128xf32, #tpu.memory_space<vmem>>, vector<1x16x128xf32>
    tpu.vector_store %arg8[%c0_65, %c8_66, %c0_67], %89 {strides = array<i32>} : memref<1x26x128xf32, #tpu.memory_space<vmem>>, vector<1x16x128xf32>,
    %91 = vector.extract_strided_slice %89 {offsets = [0, 0, 0], sizes = [1, 1, 128], strides = [1, 1, 1]} : vector<1x16x128xf32> to vector<1x1x128xf32>
    %92 = vector.shape_cast %91 : vector<1x1x128xf32> to vector<1x1x128xf32>
    %93 = vector.broadcast %92 : vector<1x1x128xf32> to vector<1x2x128xf32>
    %c0_68 = arith.constant 0 : index
    %c6_69 = arith.constant 6 : index
    %c0_70 = arith.constant 0 : index
    %94 = vector.load %arg8[%c0_68, %c6_69, %c0_70] : memref<1x26x128xf32, #tpu.memory_space<vmem>>, vector<1x2x128xf32>
    tpu.vector_store %arg8[%c0_68, %c6_69, %c0_70], %93 {strides = array<i32>} : memref<1x26x128xf32, #tpu.memory_space<vmem>>, vector<1x2x128xf32>,
    %95 = vector.extract_strided_slice %89 {offsets = [0, 15, 0], sizes = [1, 1, 128], strides = [1, 1, 1]} : vector<1x16x128xf32> to vector<1x1x128xf32>
    %96 = vector.shape_cast %95 : vector<1x1x128xf32> to vector<1x1x128xf32>
    %97 = vector.broadcast %96 : vector<1x1x128xf32> to vector<1x2x128xf32>
    %c0_71 = arith.constant 0 : index
    %c24_72 = arith.constant 24 : index
    %c0_73 = arith.constant 0 : index
    %98 = vector.load %arg8[%c0_71, %c24_72, %c0_73] : memref<1x26x128xf32, #tpu.memory_space<vmem>>, vector<1x2x128xf32>
    tpu.vector_store %arg8[%c0_71, %c24_72, %c0_73], %97 {strides = array<i32>} : memref<1x26x128xf32, #tpu.memory_space<vmem>>, vector<1x2x128xf32>,
    %c0_74 = arith.constant 0 : index
    %c6_75 = arith.constant 6 : index
    %c0_76 = arith.constant 0 : index
    %99 = vector.load %arg8[%c0_74, %c6_75, %c0_76] : memref<1x26x128xf32, #tpu.memory_space<vmem>>, vector<1x16x128xf32>
    %c0_77 = arith.constant 0 : index
    %c7_78 = arith.constant 7 : index
    %c0_79 = arith.constant 0 : index
    %100 = vector.load %arg8[%c0_77, %c7_78, %c0_79] : memref<1x26x128xf32, #tpu.memory_space<vmem>>, vector<1x16x128xf32>
    %c0_80 = arith.constant 0 : index
    %c8_81 = arith.constant 8 : index
    %c0_82 = arith.constant 0 : index
    %101 = vector.load %arg8[%c0_80, %c8_81, %c0_82] : memref<1x26x128xf32, #tpu.memory_space<vmem>>, vector<1x16x128xf32>
    %c0_83 = arith.constant 0 : index
    %c9_84 = arith.constant 9 : index
    %c0_85 = arith.constant 0 : index
    %102 = vector.load %arg8[%c0_83, %c9_84, %c0_85] : memref<1x26x128xf32, #tpu.memory_space<vmem>>, vector<1x16x128xf32>
    %c0_86 = arith.constant 0 : index
    %c10_87 = arith.constant 10 : index
    %c0_88 = arith.constant 0 : index
    %103 = vector.load %arg8[%c0_86, %c10_87, %c0_88] : memref<1x26x128xf32, #tpu.memory_space<vmem>>, vector<1x16x128xf32>
    %104 = arith.addf %99, %100 : vector<1x16x128xf32>
    %105 = arith.addf %101, %102 : vector<1x16x128xf32>
    %106 = arith.addf %104, %105 : vector<1x16x128xf32>
    %107 = arith.addf %106, %103 : vector<1x16x128xf32>
    %cst_89 = arith.constant 2.000000e-01 : f32
    %108 = vector.broadcast %cst_89 : f32 to vector<1x16x128xf32>
    %109 = arith.mulf %107, %108 : vector<1x16x128xf32>
    %110 = arith.subf %89, %109 : vector<1x16x128xf32>
    %c0_90 = arith.constant 0 : index
    %c0_91 = arith.constant 0 : index
    %c0_92 = arith.constant 0 : index
    %111 = vector.load %arg6[%c0_90, %c0_91, %c0_92] : memref<1x16x128xf32, #tpu.memory_space<vmem>>, vector<1x16x128xf32>
    tpu.vector_store %arg6[%c0_90, %c0_91, %c0_92], %110 {strides = array<i32>} : memref<1x16x128xf32, #tpu.memory_space<vmem>>, vector<1x16x128xf32>,
    %c0_93 = arith.constant 0 : index
    %c8_94 = arith.constant 8 : index
    %c0_95 = arith.constant 0 : index
    %112 = vector.load %arg8[%c0_93, %c8_94, %c0_95] : memref<1x26x128xf32, #tpu.memory_space<vmem>>, vector<1x16x128xf32>
    tpu.vector_store %arg8[%c0_93, %c8_94, %c0_95], %110 {strides = array<i32>} : memref<1x26x128xf32, #tpu.memory_space<vmem>>, vector<1x16x128xf32>,
    %113 = vector.extract_strided_slice %110 {offsets = [0, 0, 0], sizes = [1, 1, 128], strides = [1, 1, 1]} : vector<1x16x128xf32> to vector<1x1x128xf32>
    %114 = vector.shape_cast %113 : vector<1x1x128xf32> to vector<1x1x128xf32>
    %115 = vector.broadcast %114 : vector<1x1x128xf32> to vector<1x2x128xf32>
    %c0_96 = arith.constant 0 : index
    %c6_97 = arith.constant 6 : index
    %c0_98 = arith.constant 0 : index
    %116 = vector.load %arg8[%c0_96, %c6_97, %c0_98] : memref<1x26x128xf32, #tpu.memory_space<vmem>>, vector<1x2x128xf32>
    tpu.vector_store %arg8[%c0_96, %c6_97, %c0_98], %115 {strides = array<i32>} : memref<1x26x128xf32, #tpu.memory_space<vmem>>, vector<1x2x128xf32>,
    %117 = vector.extract_strided_slice %110 {offsets = [0, 15, 0], sizes = [1, 1, 128], strides = [1, 1, 1]} : vector<1x16x128xf32> to vector<1x1x128xf32>
    %118 = vector.shape_cast %117 : vector<1x1x128xf32> to vector<1x1x128xf32>
    %119 = vector.broadcast %118 : vector<1x1x128xf32> to vector<1x2x128xf32>
    %c0_99 = arith.constant 0 : index
    %c24_100 = arith.constant 24 : index
    %c0_101 = arith.constant 0 : index
    %120 = vector.load %arg8[%c0_99, %c24_100, %c0_101] : memref<1x26x128xf32, #tpu.memory_space<vmem>>, vector<1x2x128xf32>
    tpu.vector_store %arg8[%c0_99, %c24_100, %c0_101], %119 {strides = array<i32>} : memref<1x26x128xf32, #tpu.memory_space<vmem>>, vector<1x2x128xf32>,
    %c0_102 = arith.constant 0 : index
    %c6_103 = arith.constant 6 : index
    %c0_104 = arith.constant 0 : index
    %121 = vector.load %arg8[%c0_102, %c6_103, %c0_104] : memref<1x26x128xf32, #tpu.memory_space<vmem>>, vector<1x16x128xf32>
    %c0_105 = arith.constant 0 : index
    %c7_106 = arith.constant 7 : index
    %c0_107 = arith.constant 0 : index
    %122 = vector.load %arg8[%c0_105, %c7_106, %c0_107] : memref<1x26x128xf32, #tpu.memory_space<vmem>>, vector<1x16x128xf32>
    %c0_108 = arith.constant 0 : index
    %c8_109 = arith.constant 8 : index
    %c0_110 = arith.constant 0 : index
    %123 = vector.load %arg8[%c0_108, %c8_109, %c0_110] : memref<1x26x128xf32, #tpu.memory_space<vmem>>, vector<1x16x128xf32>
    %c0_111 = arith.constant 0 : index
    %c9_112 = arith.constant 9 : index
    %c0_113 = arith.constant 0 : index
    %124 = vector.load %arg8[%c0_111, %c9_112, %c0_113] : memref<1x26x128xf32, #tpu.memory_space<vmem>>, vector<1x16x128xf32>
    %c0_114 = arith.constant 0 : index
    %c10_115 = arith.constant 10 : index
    %c0_116 = arith.constant 0 : index
    %125 = vector.load %arg8[%c0_114, %c10_115, %c0_116] : memref<1x26x128xf32, #tpu.memory_space<vmem>>, vector<1x16x128xf32>
    %126 = arith.addf %121, %122 : vector<1x16x128xf32>
    %127 = arith.addf %123, %124 : vector<1x16x128xf32>
    %128 = arith.addf %126, %127 : vector<1x16x128xf32>
    %129 = arith.addf %128, %125 : vector<1x16x128xf32>
    %cst_117 = arith.constant 2.000000e-01 : f32
    %130 = vector.broadcast %cst_117 : f32 to vector<1x16x128xf32>
    %131 = arith.mulf %129, %130 : vector<1x16x128xf32>
    %cst_118 = arith.constant 3.000000e+00 : f32
    %132 = vector.broadcast %cst_118 : f32 to vector<1x16x128xf32>
    %133 = arith.mulf %132, %131 : vector<1x16x128xf32>
    %c0_119 = arith.constant 0 : index
    %c8_120 = arith.constant 8 : index
    %c0_121 = arith.constant 0 : index
    %134 = vector.load %arg8[%c0_119, %c8_120, %c0_121] : memref<1x26x128xf32, #tpu.memory_space<vmem>>, vector<1x16x128xf32>
    tpu.vector_store %arg8[%c0_119, %c8_120, %c0_121], %133 {strides = array<i32>} : memref<1x26x128xf32, #tpu.memory_space<vmem>>, vector<1x16x128xf32>,
    %135 = vector.extract_strided_slice %133 {offsets = [0, 15, 0], sizes = [1, 1, 128], strides = [1, 1, 1]} : vector<1x16x128xf32> to vector<1x1x128xf32>
    %c0_122 = arith.constant 0 : index
    %c7_123 = arith.constant 7 : index
    %c0_124 = arith.constant 0 : index
    %136 = vector.load %arg8[%c0_122, %c7_123, %c0_124] : memref<1x26x128xf32, #tpu.memory_space<vmem>>, vector<1x1x128xf32>
    tpu.vector_store %arg8[%c0_122, %c7_123, %c0_124], %135 {strides = array<i32>} : memref<1x26x128xf32, #tpu.memory_space<vmem>>, vector<1x1x128xf32>,
    %137 = vector.extract_strided_slice %133 {offsets = [0, 0, 0], sizes = [1, 1, 128], strides = [1, 1, 1]} : vector<1x16x128xf32> to vector<1x1x128xf32>
    %c0_125 = arith.constant 0 : index
    %c24_126 = arith.constant 24 : index
    %c0_127 = arith.constant 0 : index
    %138 = vector.load %arg8[%c0_125, %c24_126, %c0_127] : memref<1x26x128xf32, #tpu.memory_space<vmem>>, vector<1x1x128xf32>
    tpu.vector_store %arg8[%c0_125, %c24_126, %c0_127], %137 {strides = array<i32>} : memref<1x26x128xf32, #tpu.memory_space<vmem>>, vector<1x1x128xf32>,
    %c0_128 = arith.constant 0 : index
    %c7_129 = arith.constant 7 : index
    %c0_130 = arith.constant 0 : index
    %139 = vector.load %arg8[%c0_128, %c7_129, %c0_130] : memref<1x26x128xf32, #tpu.memory_space<vmem>>, vector<1x16x128xf32>
    %c0_131 = arith.constant 0 : index
    %c8_132 = arith.constant 8 : index
    %c0_133 = arith.constant 0 : index
    %140 = vector.load %arg8[%c0_131, %c8_132, %c0_133] : memref<1x26x128xf32, #tpu.memory_space<vmem>>, vector<1x16x128xf32>
    %c0_134 = arith.constant 0 : index
    %c9_135 = arith.constant 9 : index
    %c0_136 = arith.constant 0 : index
    %141 = vector.load %arg8[%c0_134, %c9_135, %c0_136] : memref<1x26x128xf32, #tpu.memory_space<vmem>>, vector<1x16x128xf32>
    %142 = tpu.concatenate %139, %140, %141 in 2 : vector<1x16x128xf32>, vector<1x16x128xf32>, vector<1x16x128xf32> -> vector<1x16x384xf32>
    %143 = vector.shape_cast %142 : vector<1x16x384xf32> to vector<16x384xf32>
    %144 = arith.truncf %143 : vector<16x384xf32> to vector<16x384xbf16>
    %c0_137 = arith.constant 0 : index
    %c0_138 = arith.constant 0 : index
    %145 = vector.load %arg5[%c0_137, %c0_138] : memref<384x128xbf16, #tpu.memory_space<vmem>>, vector<384x128xbf16>
    %cst_139 = arith.constant dense<0.000000e+00> : vector<16x128xf32>
    %146 = tpu.matmul %144, %145, %cst_139 {dimension_numbers = #tpu.dot_dimension_numbers<[1], [0], [0], [1], [0, 0, 1, 1], [], []>} : vector<16x384xbf16>, vector<384x128xbf16>, vector<16x128xf32> -> vector<16x128xf32>
    %147 = vector.shape_cast %146 : vector<16x128xf32> to vector<1x16x128xf32>
    %c0_140 = arith.constant 0 : index
    %c0_141 = arith.constant 0 : index
    %c0_142 = arith.constant 0 : index
    %148 = vector.load %arg7[%c0_140, %c0_141, %c0_142] : memref<1x16x128xf32, #tpu.memory_space<vmem>>, vector<1x16x128xf32>
    tpu.vector_store %arg7[%c0_140, %c0_141, %c0_142], %147 {strides = array<i32>} : memref<1x16x128xf32, #tpu.memory_space<vmem>>, vector<1x16x128xf32>,
    return
  }
  func.func @transform_0(%arg0: i32) -> (i32, i32, i32) {
    %c0_i32 = arith.constant 0 : i32
    %c0_i32_0 = arith.constant 0 : i32
    %c0_i32_1 = arith.constant 0 : i32
    return %arg0, %c0_i32, %c0_i32_0 : i32, i32, i32
  }
  func.func @transform_1(%arg0: i32) -> (i32, i32, i32) {
    %c0_i32 = arith.constant 0 : i32
    %c0_i32_0 = arith.constant 0 : i32
    %c0_i32_1 = arith.constant 0 : i32
    return %arg0, %c0_i32, %c0_i32_0 : i32, i32, i32
  }
  func.func @transform_2(%arg0: i32) -> (i32, i32) {
    %c0_i32 = arith.constant 0 : i32
    %c0_i32_0 = arith.constant 0 : i32
    %c0_i32_1 = arith.constant 0 : i32
    return %c0_i32, %c0_i32_0 : i32, i32
  }
  func.func @transform_3(%arg0: i32) -> (i32, i32) {
    %c0_i32 = arith.constant 0 : i32
    %c0_i32_0 = arith.constant 0 : i32
    %c0_i32_1 = arith.constant 0 : i32
    return %c0_i32, %c0_i32_0 : i32, i32
  }
  func.func @transform_4(%arg0: i32) -> (i32, i32) {
    %c0_i32 = arith.constant 0 : i32
    %c0_i32_0 = arith.constant 0 : i32
    %c0_i32_1 = arith.constant 0 : i32
    return %c0_i32, %c0_i32_0 : i32, i32
  }
  func.func @transform_5(%arg0: i32) -> (i32, i32, i32) {
    %c0_i32 = arith.constant 0 : i32
    %c0_i32_0 = arith.constant 0 : i32
    %c0_i32_1 = arith.constant 0 : i32
    return %arg0, %c0_i32, %c0_i32_0 : i32, i32, i32
  }
  func.func @transform_6(%arg0: i32) -> (i32, i32, i32) {
    %c0_i32 = arith.constant 0 : i32
    %c0_i32_0 = arith.constant 0 : i32
    %c0_i32_1 = arith.constant 0 : i32
    return %arg0, %c0_i32, %c0_i32_0 : i32, i32, i32
  }
}

</mosaic_0001>

<bundles_post_ra>
// kernel: tpu_custom_call.1
= control target key start
LH: loop header
LB: loop body
LE: loop exit
PB: predicated region body
PF: predicated region fallthrough
CT: control target
= control target key end

     0   :  { %s2674_s0 = inlined_call_operand.hbm [shape: f32[2,16,128], index: 0, kind: input, shape index: {}]   ;;  %s2675_s1 = inlined_call_operand.hbm [shape: bf16[2,24,128], index: 1, kind: input, shape index: {}]   ;;  %s2676_s2 = inlined_call_operand.hbm [shape: bf16[128,256], index: 2, kind: input, shape index: {}]   ;;  %s2677_s3 = inlined_call_operand.hbm [shape: bf16[256,128], index: 3, kind: input, shape index: {}]   ;;  %s2678_s4 = inlined_call_operand.hbm [shape: bf16[384,128], index: 4, kind: input, shape index: {}]   ;;  %s2679_s5 = inlined_call_operand.hbm [shape: f32[2,16,128], index: 5, kind: output, shape index: {0}]   ;;  %s2680_s6 = inlined_call_operand.hbm [shape: f32[2,16,128], index: 6, kind: output, shape index: {1}]  }
   0x1   :  { %2688 = sst [smem:[#allocation21_spill]] %s2674_s0 }
   0x2   :  { %2689 = sst [smem:[#allocation22_spill]] %s2676_s2 }
   0x3   :  { %2690 = sst [smem:[#allocation23_spill]] %s2677_s3 }
   0x4   :  { %2691 = sst [smem:[#allocation24_spill]] %s2678_s4 }
   0x5   :  { %12 = vsyncpa [#allocation4], 0 }
   0x6   :  { %14 = vsyncpa [#allocation4 + $0x1], 0 }
   0x7   :  { %15 = vsyncpa [#allocation7], 0 }
   0x8   :  { %17 = vsyncpa [#allocation7 + $0x1], 0 }
   0x9   :  { %18 = vsyncpa [#allocation10], 0 }
   0xa   :  { %19 = vsyncpa [#allocation5], 0 }
   0xb   :  { %21 = vsyncpa [#allocation5 + $0x1], 0 }
   0xc   :  { %22 = vsyncpa [#allocation14], 0 }
   0xd   :  { %24 = vsyncpa [#allocation14 + $0x1], 0  ;;  %s2235_s21 = smov 0   ;;  %s2237_s22 = smov 0  }
   0xe   :  { %s2239_s23 = smov 0   ;;  %s2241_s24 = smov 0  }
   0xf LB: > { %s2256_s25 = sadd.s32 4294967295, %s2182_s24   ;;  %s1548_s26 = sadd.s32 4294967294, %s2182_s24   ;;  %s2182_s24 = sphi %s2241_s24, %s2720_s24   ;;  %s2178_s23 = sphi %s2239_s23, %s2719_s23   ;;  %s2174_s22 = sphi %s2237_s22, %s2718_s22   ;;  %s2170_s21 = sphi %s2235_s21, %s2717_s21  }
  0x10   : > { %p50_p0 = scmp.ne.s32.totalorder %s2174_s22, %s2170_s21  ;;  %p2681_p1 = scmp.eq.s32.totalorder %s2256_s25, 0 }
  0x11   : > { %p169_p3 = scmp.eq.s32.totalorder %s1548_s26, 1  ;;  %p1549_p5 = scmp.ge.s32.totalorder %s2182_s24, 1 }
  0x12   : > { %p2265_p4 = por %p2681_p1, %p50_p0  ;;  %p202_p7 = scmp.lt.s32.totalorder %s2182_s24, 3 }
  0x13   : > { %p2270_p6 = por %p169_p3, %p50_p0  ;;  %s2184_s30 = smov [#allocation8]  }
  0x14   : > { %s2692_s27 = scalar_select %p2265_p4, 1, 0 }
  0x15   : > { %s2693_s28 = scalar_select %p2270_p6, 1, 0 }
  0x16   : > { %p2275_p8 = pnand %p1549_p5, %p202_p7  ;;  %s214_s7 = sshll.u32 %s2184_s30, 4  ;;  %s2279_s7 = int_to_ptr.vmem [resolvable:$true] %s214_s7 }
  0x17   : > { %s2185_s9 = smov [#allocation9]   ;;  %s2696_s2 = sld [smem:[#allocation22_spill]] }
  0x18   : > { %s2694_s29 = scalar_select %p2275_p8, 1, 0 }
  0x19   : > { %p1770_p9 = pneg %p2275_p8  ;;  %s227_s10 = sshll.u32 %s2185_s9, 4  ;;  %s2290_s10 = int_to_ptr.vmem [resolvable:$true] %s227_s10 }
  0x1b   : > { %p2286_p11 = pnand %p1770_p9, %p2681_p1 }
  0x1d   : > { %s1928_s13 = scalar_lea.hbm %s2696_s2, 2048  ;;  %p2300_p13 = pneg %p2286_p11 }
  0x1e   : > { %p1929_p12 = scmp.ne.s32.totalorder %s2696_s2, %s1928_s13  ;;  %p1935_p5 = scmp.lt.u32.totalorder %s1928_s13, %s2696_s2 }
  0x20   : > { %p1931_p0 = pnand %p2300_p13, %p1929_p12 }
  0x22   : > { %p1932_p3 = pneg %p1931_p0 }
  0x24   : > { %p1937_p7 = pnand %p1935_p5, %p1932_p3 }
  0x26   : > { %1940 = shalt.err (!%p1937_p7)
}
  0x27   : > { %s1941_s19 = scalar_lea.vmem %s2279_s7, 2048  ;;  %p1949_p2 = scmp.lt.s32.totalorder %s2279_s7, %s2279_s7 }
  0x28   : > { %p1942_p9 = scmp.ne.s32.totalorder %s2279_s7, %s1941_s19  ;;  %p1950_p6 = scmp.lt.s32.totalorder %s1941_s19, %s1941_s19 }
  0x2a   : > { %p1944_p10 = pnand %p1942_p9, %p2300_p13  ;;  %p1951_p12 = por %p1950_p6, %p1949_p2 }
  0x2c   : > { %p1945_p1 = pneg %p1944_p10 }
  0x2e   : > { %p1952_p0 = pnand %p1951_p12, %p1945_p1 }
  0x30   : > { %1955 = shalt.err (!%p1952_p0)
}
  0x31   : > { %s2682_s20 = smov 128   ;;  %s2683_s26 = smov 8  }
  0x32   : > { %1773 = dma.hbm_to_vmem [thread:$0]  (!%p2286_p11), %s2696_s2, 2048, %s2279_s7, [#allocation7], %s2682_s20, %s2682_s20, %s2683_s26  }
  0x33   : > { %s2698_s3 = sld [smem:[#allocation23_spill]] }
  0x39   : > { %s1956_s13 = scalar_lea.hbm %s2698_s3, 2048 }
  0x3a   : > { %p1957_p1 = scmp.ne.s32.totalorder %s2698_s3, %s1956_s13  ;;  %p1963_p10 = scmp.lt.u32.totalorder %s1956_s13, %s2698_s3 }
  0x3c   : > { %p1959_p2 = pnand %p1957_p1, %p2300_p13 }
  0x3e   : > { %p1960_p6 = pneg %p1959_p2 }
  0x40   : > { %p1965_p3 = pnand %p1963_p10, %p1960_p6 }
  0x42   : > { %1968 = shalt.err (!%p1965_p3)
}
  0x43   : > { %s1969_s7 = scalar_lea.vmem %s2290_s10, 2048  ;;  %p1977_p12 = scmp.lt.s32.totalorder %s2290_s10, %s2290_s10 }
  0x44   : > { %p1970_p5 = scmp.ne.s32.totalorder %s2290_s10, %s1969_s7  ;;  %p1978_p0 = scmp.lt.s32.totalorder %s1969_s7, %s1969_s7 }
  0x46   : > { %p1972_p7 = pnand %p1970_p5, %p2300_p13  ;;  %p1979_p1 = por %p1978_p0, %p1977_p12 }
  0x48   : > { %p1973_p9 = pneg %p1972_p7 }
  0x4a   : > { %p1980_p2 = pnand %p1979_p1, %p1973_p9 }
  0x4c   : > { %1983 = shalt.err (!%p1980_p2)
}
  0x4d   : > { %s2686_s19 = smov 64   ;;  %s2687_s30 = smov 4  }
  0x4e   : > { %1776 = dma.hbm_to_vmem [thread:$0]  (!%p2286_p11), %s2698_s3, 2048, %s2290_s10, [#allocation10], %s2686_s19, %s2686_s19, %s2687_s30  }
  0x4f   : > { %s2190_s12 = smov [#allocation11]   ;;  %s2351_s14 = sadd.s32 1, %s2182_s24  }
  0x50   : > { %s240_s13 = sshll.u32 %s2190_s12, 4  ;;  %s2699_s4 = sld [smem:[#allocation24_spill]]  ;;  %s241_s13 = int_to_ptr.vmem [resolvable:$true] %s240_s13 }
  0x56   : > { %s1984_s18 = scalar_lea.hbm %s2699_s4, 3072 }
  0x57   : > { %p1985_p6 = scmp.ne.s32.totalorder %s2699_s4, %s1984_s18  ;;  %p1991_p5 = scmp.lt.u32.totalorder %s1984_s18, %s2699_s4 }
  0x59   : > { %p1987_p10 = pnand %p1985_p6, %p2300_p13 }
  0x5b   : > { %p1988_p3 = pneg %p1987_p10 }
  0x5d   : > { %p1993_p7 = pnand %p1991_p5, %p1988_p3 }
  0x5f   : > { %1996 = shalt.err (!%p1993_p7)
}
  0x60   : > { %s1997_s10 = scalar_lea.vmem %s241_s13, 3072  ;;  %p2005_p1 = scmp.lt.s32.totalorder %s241_s13, %s241_s13 }
  0x61   : > { %p1998_p9 = scmp.ne.s32.totalorder %s241_s13, %s1997_s10  ;;  %p2006_p2 = scmp.lt.s32.totalorder %s1997_s10, %s1997_s10 }
  0x63   : > { %p2000_p12 = pnand %p1998_p9, %p2300_p13  ;;  %p2007_p4 = por %p2006_p2, %p2005_p1 }
  0x65   : > { %p2001_p0 = pneg %p2000_p12 }
  0x67   : > { %p2008_p8 = pnand %p2007_p4, %p2001_p0 }
  0x69   : > { %2011 = shalt.err (!%p2008_p8)
}
  0x6a   : > { %1779 = dma.hbm_to_vmem [thread:$0]  (!%p2286_p11), %s2699_s4, 3072, %s241_s13, [#allocation10], %s2686_s19, %s2686_s19, %s2687_s30  }
  0x6b   : > { %s34_s16 = ssub.s32 %s2182_s24, %s2351_s14  ;;  %s37_s8 = sadd.s32 1, %s2178_s23 }
  0x6c   : > { %p35_p4 = scmp.eq.s32.totalorder %s34_s16, 0  ;;  %p44_p8 = scmp.ne.s32.totalorder %s2178_s23, %s2174_s22 }
  0x6d   : > { %p45_p13 = scmp.eq.s32.totalorder %s2182_s24, 0  ;;  %p1797_p6 = scmp.lt.s32.totalorder %s2182_s24, 2 }
  0x6e   : > { %s2382_s26 = scalar_select %p35_p4, %s2178_s23, %s37_s8  }
  0x6f   : > { %p46_p10 = por %p45_p13, %p44_p8  ;;  %p2700_p3 = scmp.eq.s32.totalorder %s2256_s25, 1 }
  0x70   : > { %s2391_s11 = sand.u32 1, %s2178_s23   ;;  %s1633_s12 = sshll.u32 %s2182_s24, 8 }
  0x71   : > { %p2386_p5 = por %p2700_p3, %p44_p8  ;;  %s1554_s13 = sshll.u32 %s2391_s11, 4 }
  0x72   : > { %s2702_s0 = sld [smem:[#allocation21_spill]]  ;;  %s258_s7 = scalar_lea.vmem [#allocation3], %s1554_s13 }
  0x73   : > { %s265_s10 = sshll.u32 %s258_s7, 4  ;;  %p2400_p11 = pnand %p1797_p6, %p46_p10  ;;  %s2404_s10 = int_to_ptr.vmem [resolvable:$true] %s265_s10 }
  0x74   : > { %s255_s16 = scalar_lea.sflag [#allocation4], %s2391_s11 }
  0x75   : > { %p2014_p9 = pneg %p2400_p11 }
  0x78   : > { %s2398_s18 = scalar_lea.hbm %s2702_s0, %s1633_s12  ;;  %s2017_s15 = scalar_lea.hbm %s2702_s0, 512 }
  0x79   : > { %s2012_s8 = scalar_lea.hbm %s2398_s18, 256  ;;  %p2018_p1 = scmp.lt.u32.totalorder %s2398_s18, %s2702_s0 }
  0x7a   : > { %p2013_p7 = scmp.ne.s32.totalorder %s2398_s18, %s2012_s8  ;;  %p2019_p2 = scmp.lt.u32.totalorder %s2017_s15, %s2012_s8 }
  0x7b   : > { %p2021_p8 = scmp.lt.u32.totalorder %s2012_s8, %s2398_s18 }
  0x7c   : > { %p2015_p12 = pnand %p2014_p9, %p2013_p7  ;;  %p2020_p4 = por %p2019_p2, %p2018_p1 }
  0x7e   : > { %p2016_p0 = pneg %p2015_p12  ;;  %p2022_p13 = por %p2021_p8, %p2020_p4 }
  0x80   : > { %p2023_p6 = pnand %p2022_p13, %p2016_p0 }
  0x82   : > { %2026 = shalt.err (!%p2023_p6)
}
  0x83   : > { %s2027_s19 = scalar_lea.vmem %s2404_s10, 256  ;;  %s2191_s12 = smov [#allocation3]  }
  0x84   : > { %p2028_p10 = scmp.ne.s32.totalorder %s2404_s10, %s2027_s19  ;;  %s2032_s13 = sshll.u32 %s2191_s12, 4  ;;  %s2033_s13 = int_to_ptr.vmem [resolvable:$false] %s2032_s13 }
  0x85   : > { %s2034_s17 = scalar_lea.vmem %s2033_s13, 512  ;;  %p2035_p12 = scmp.lt.s32.totalorder %s2404_s10, %s2033_s13 }
  0x86   : > { %p2030_p3 = pnand %p2028_p10, %p2014_p9  ;;  %p2036_p1 = scmp.lt.s32.totalorder %s2034_s17, %s2027_s19 }
  0x88   : > { %p2031_p7 = pneg %p2030_p3  ;;  %p2037_p2 = por %p2036_p1, %p2035_p12 }
  0x8a   : > { %p2038_p4 = pnand %p2037_p2, %p2031_p7 }
  0x8c   : > { %2041 = shalt.err (!%p2038_p4)
}
  0x8d   : > { %s2704_s8 = smov 8   ;;  %s2705_s15 = smov 128  }
  0x8e   : > { %1783 = dma.hbm_to_vmem [thread:$0]  (!%p2400_p11), %s2398_s18, 256, %s2404_s10, %s255_s16, %s2705_s15, %s2705_s15, %s2704_s8  }
  0x8f   : > { %s1747_s7 = smul.u32 12, %s2391_s11  ;;  %s2706_s0 = sand.u32 1, %s2182_s24  }
  0x90   : > { %s1748_s12 = smul.u32 192, %s2182_s24  ;;  %s2449_s3 = scalar_lea.sflag [#allocation7], %s2706_s0 }
  0x91   : > { %s279_s30 = scalar_lea.vmem [#allocation6], %s1747_s7  ;;  %s2047_s10 = scalar_lea.hbm %s2675_s1, 384 }
  0x92   : > { %s2443_s17 = scalar_lea.hbm %s2675_s1, %s1748_s12  ;;  %s286_s20 = sshll.u32 %s279_s30, 4  ;;  %s2445_s20 = int_to_ptr.vmem [resolvable:$true] %s286_s20 }
  0x93   : > { %s2042_s4 = scalar_lea.hbm %s2443_s17, 192  ;;  %p2048_p6 = scmp.lt.u32.totalorder %s2443_s17, %s2675_s1 }
  0x94   : > { %p2043_p0 = scmp.ne.s32.totalorder %s2443_s17, %s2042_s4  ;;  %p2049_p10 = scmp.lt.u32.totalorder %s2047_s10, %s2042_s4 }
  0x95   : > { %p2051_p7 = scmp.lt.u32.totalorder %s2042_s4, %s2443_s17 }
  0x96   : > { %p2045_p8 = pnand %p2043_p0, %p2014_p9  ;;  %p2050_p3 = por %p2049_p10, %p2048_p6 }
  0x98   : > { %p2046_p13 = pneg %p2045_p8  ;;  %p2052_p12 = por %p2051_p7, %p2050_p3 }
  0x9a   : > { %p2053_p1 = pnand %p2052_p12, %p2046_p13 }
  0x9c   : > { %2056 = shalt.err (!%p2053_p1)
}
  0x9d   : > { %s2057_s0 = scalar_lea.vmem %s2445_s20, 192  ;;  %s2192_s30 = smov [#allocation6]  }
  0x9e   : > { %p2058_p2 = scmp.ne.s32.totalorder %s2445_s20, %s2057_s0  ;;  %s2062_s15 = sshll.u32 %s2192_s30, 4  ;;  %s2063_s15 = int_to_ptr.vmem [resolvable:$false] %s2062_s15 }
  0x9f   : > { %s2064_s7 = scalar_lea.vmem %s2063_s15, 384  ;;  %p2065_p8 = scmp.lt.s32.totalorder %s2445_s20, %s2063_s15 }
  0xa0   : > { %p2060_p4 = pnand %p2058_p2, %p2014_p9  ;;  %p2066_p6 = scmp.lt.s32.totalorder %s2064_s7, %s2057_s0 }
  0xa2   : > { %p2061_p0 = pneg %p2060_p4  ;;  %p2067_p10 = por %p2066_p6, %p2065_p8 }
  0xa4   : > { %p2068_p3 = pnand %p2067_p10, %p2061_p0 }
  0xa6   : > { %2071 = shalt.err (!%p2068_p3)
}
  0xa7   : > { %s2707_s4 = smov 4   ;;  %s2708_s12 = smov 64  }
  0xa8   : > { %1786 = dma.hbm_to_vmem [thread:$0]  (!%p2400_p11), %s2443_s17, 192, %s2445_s20, %s2449_s3, %s2708_s12, %s2708_s12, %s2707_s4  }
  0xa9   : > { %p2709_p9 = scmp.ne.s32.totalorder %s2694_s29, 0 }
  0xaa   : > { %s2481_s19 = sand.u32 (!%p2709_p9), 1, %s2174_s22   ;;  %p2710_p13 = scmp.ne.s32.totalorder (!%p2709_p9), %s2692_s27, 0 }
  0xab   : > { %298 = sbr.rel (%p2709_p9) target bundleno = 2465 (0x9a1), region = 40  ;;  %s2484_s13 = sshll.u32 (!%p2709_p9), %s2481_s19, 4 }
  0xac   : > { %s301_s2 = scalar_lea.sflag (!%p2709_p9), [#allocation4], %s2481_s19  ;;  %s304_s11 = scalar_lea.vmem (!%p2709_p9), [#allocation3], %s2484_s13 }
  0xb2   : > { %2145 = dma.done.wait (%p2710_p13), %s301_s2, 256  }
  0xb3   : > { %2147 = vsyncadd (%p2710_p13), %s301_s2, 4294967040  ;;  %s309_s3 = sand.u32 1, %s2256_s25   ;;  %s1749_s29 = smul.u32 12, %s2481_s19 }
  0xb4   : > { %s310_s20 = scalar_lea.sflag [#allocation7], %s309_s3 }
  0xb5   : > { %s2494_s17 = scalar_lea.vmem [#allocation6], %s1749_s29 }
  0xb6   : > { %2149 = dma.done.wait (%p2710_p13), %s310_s20, 192  }
  0xb7   : > { %2151 = vsyncadd (%p2710_p13), %s310_s20, 4294967104  ;;  %p2711_p11 = scmp.eq.s32.totalorder %s2256_s25, 0 }
  0xb9   : > { %2153 = dma.done.wait (%p2711_p11), [#allocation7], 2048   ;;  %p2712_p7 = pmov %p2711_p11 }
  0xbb   : > { %2155 = vsyncadd (%p2712_p7), [#allocation7], 4294965248  ;;  %p2713_p12 = pmov %p2712_p7 }
  0xbc   : > { %p2714_p1 = pmov %p2712_p7 }
  0xbd   : > { %2157 = dma.done.wait (%p2713_p12), [#allocation10], 5120  }
  0xbe   : > { %2159 = vsyncadd (%p2714_p1), [#allocation10], 4294962176  ;;  %v2193_v0 = vmov 0.0   ;;  %vm2194_vm0 = vmmov 0   ;;  %v365_v1 = vld [vmem:[%s304_s11] sm:$0xff]  ;;  %v366_v2 = vld [vmem:[%s304_s11 + $0x8] sm:$0xff]  ;;  %v487_v32 = vlaneseq }
  0xbf   : > { %1699 = vmatprep.subr.bf16.mxu0 %v2193_v0  ;;  %1701 = vmatprep.mubr.msk.bf16.mxu0 %vm2194_vm0, %v2193_v0  ;;  %v370_v3 = vpack.c.bf16 %v366_v2, %v365_v1  ;;  %v371_v4 = vmul.f32 0.088388346, %v365_v1  ;;  %v372_v5 = vmul.f32 0.088388346, %v366_v2  ;;  %vm415_vm1 = vcmask 130048   ;;  %v1846_v30 = vld [vmem:[%s2494_s17] sm:$0xff]  }
  0xc0   : > { %1705 = vmatprep.subr.bf16.mxu1 %v2193_v0  ;;  %1707 = vmatprep.mubr.msk.bf16.mxu1 %vm2194_vm0, %v2193_v0  ;;  %v2529_v31 = vld [vmem:[%s2494_s17 + $0x8] ss:$0 sps:$4 sm:$0xff]   ;;  %v488_v33 = vshrl.u32 %v487_v32, 7  ;;  %vm573_vm2 = vcmask 195584   ;;  %vm600_vm3 = vcmask 1043456   ;;  %s2576_s27 = scalar_lea.vmem [#allocation12], %s2484_s13 }
  0xc1   : > { %1700 = vmatpush3.bf16.xpose.msra.mxu0 %v370_v3  ;;  %1706 = vmatpush3.bf16.msra.mxu1 %v370_v3  ;;  %v373_v6 = vpack.c.bf16 %v372_v5, %v371_v4  ;;  %v1851_v32 = vld [vmem:[#allocation8 + $0x10] ss:$8 sps:$4 sm:$0xff]   ;;  %s1634_s18 = sshll.u32 %s2256_s25, 8  ;;  %s1376_s0 = sshll.u32 %s2576_s27, 4  ;;  %s2590_s0 = int_to_ptr.vmem [resolvable:$true] %s1376_s0 }
  0xc2   : > { %1711 = vmatprep.subr.bf16.mxu1 %v2193_v0  ;;  %1719 = vmatprep.subr.bf16.mxu0 %v2193_v0  ;;  %v2532_v34 = vsub.s32 0, %v488_v33  ;;  %v2534_v38 = vsub.s32 7, %v488_v33  ;;  %v1854_v33 = vld [vmem:[#allocation8 + $0x20] ss:$8 sps:$4 sm:$0xff]   ;;  %s2587_s8 = scalar_lea.hbm %s2679_s5, %s1634_s18  ;;  %s1358_s30 = scalar_lea.sflag [#allocation5], %s2481_s19 }
  0xc3   : > { %s2072_s15 = scalar_lea.vmem %s2590_s0, 256  ;;  %s2196_s7 = smov [#allocation12]  }
  0xc4   : > { %p2073_p2 = scmp.ne.s32.totalorder %s2590_s0, %s2072_s15  ;;  %s2076_s4 = sshll.u32 %s2196_s7, 4  ;;  %s2077_s4 = int_to_ptr.vmem [resolvable:$false] %s2076_s4 }
  0xc5   : > { %s2078_s12 = scalar_lea.vmem %s2077_s4, 512  ;;  %p2079_p8 = scmp.lt.s32.totalorder %s2590_s0, %s2077_s4 }
  0xc6   : > { %p2074_p4 = pnand %p2073_p2, %p2386_p5  ;;  %p2080_p6 = scmp.lt.s32.totalorder %s2078_s12, %s2072_s15 }
  0xc8   : > { %1702 = vmatmul.mubr.bf16.vlgmr.msra.gmra.mrb[0].mxu0 %v373_v6  ;;  %p2075_p0 = pneg %p2074_p4  ;;  %p2081_p10 = por %p2080_p6, %p2079_p8 }
  0xc9   : > { %1723 = vmatprep.mubr.msk.bf16.mxu0 %vm2194_vm0, %v2193_v0  ;;  %1720 = vmatpush3.bf16.msra.mxu0 %v1846_v30 }
  0xca   : > { %1721 = vmatprep.subr.bf16.mxu0 %v2193_v0  ;;  %p2082_p3 = pnand %p2081_p10, %p2075_p0 }
 0x19b   : > { %v408_v7 = vpop.f32.mrb[0].mxu0 }
 0x19c   : > { %v1703_v8 = vpop.f32.mrb[1].mxu0  ;;  %v416_v9 = vsel %vm415_vm1, %v408_v7, -inf }
 0x19d   : > { %417 = vmax.xlane.f32.xlu0 %v416_v9  ;;  %v411_v10 = vpop.f32.mrb[2].mxu0 }
 0x19e   : > { %v1704_v11 = vpop.f32.mrb[3].mxu0  ;;  %v419_v12 = vsel %vm415_vm1, %v411_v10, -inf }
 0x1a1   : > { %420 = vmax.xlane.f32.xlu0 %v419_v12 }
 0x22a   : > { %v418_v13 = vpop.xlane.xlu0 %417 }
 0x22b   : > { %v422_v14 = vsub.f32 %v408_v7, %v418_v13 }
 0x22d   : > { %v424_v15 = vmul.f32 1.442695, %v422_v14 }
 0x22e   : > { %v421_v16 = vpop.xlane.xlu0 %420 }
 0x22f   : > { %1912 = vpow2.f32 %v424_v15  ;;  %v423_v17 = vsub.f32 %v411_v10, %v421_v16 }
 0x231   : > { %v426_v18 = vmul.f32 1.442695, %v423_v17 }
 0x233   : > { %1914 = vpow2.f32 %v426_v18 }
 0x239   : > { %v1913_v19 = vpop.eup %1912 }
 0x23a   : > { %v428_v20 = vsel %vm415_vm1, %v1913_v19, 0.0 }
 0x23b   : > { %429 = vadd.xlane.f32.xlu1 %v428_v20  ;;  %v602_v20 = vsel %vm600_vm3, %v2529_v31, 0 }
 0x23c   : > { %1722 = vmatpush3.bf16.msra.mxu0 %v602_v20 }
 0x23d   : > { %v1915_v21 = vpop.eup %1914 }
 0x23e   : > { %v431_v22 = vsel %vm415_vm1, %v1915_v21, 0.0 }
 0x23f   : > { %432 = vadd.xlane.f32.xlu1 %v431_v22 }
 0x2c8   : > { %v430_v23 = vpop.xlane.xlu1 %429 }
 0x2c9   : > { %1916 = vrcp.f32 %v430_v23 }
 0x2cc   : > { %v433_v24 = vpop.xlane.xlu1 %432 }
 0x2cd   : > { %1918 = vrcp.f32 %v433_v24 }
 0x2d3   : > { %v1917_v25 = vpop.eup %1916 }
 0x2d4   : > { %v436_v27 = vmul.f32 %v1917_v25, %v1913_v19 }
 0x2d7   : > { %v1919_v26 = vpop.eup %1918 }
 0x2d8   : > { %v437_v28 = vmul.f32 %v1919_v26, %v1915_v21  ;;  %v1850_v21 = vld [vmem:[#allocation8 + $0x4] ss:$8 sps:$4 sm:$0xff]  }
 0x2d9   : > { %778 = vmatprep.subr.bf16.mxu0 %v1850_v21 }
 0x2da   : > { %v438_v29 = vpack.c.bf16 %v437_v28, %v436_v27  ;;  %v1848_v28 = vld [vmem:[#allocation8] ss:$8 sps:$4 sm:$0xff]  }
 0x2dc   : > { %1708 = vmatmul.mubr.msk.bf16.vlgmr.msra.gmra.mrb[0].mxu1 %vm415_vm1, %v438_v29 }
 0x2dd   : > { %1715 = vmatprep.mubr.msk.bf16.mxu1 %vm2194_vm0, %v2193_v0  ;;  %1712 = vmatpush3.bf16.xpose.msra.mxu1 %v1846_v30  ;;  %v1853_v30 = vld [vmem:[#allocation8 + $0x14] ss:$8 sps:$4 sm:$0xff]  }
 0x2de   : > { %1713 = vmatprep.subr.bf16.mxu1 %v2193_v0 }
 0x2e5   : > { %1714 = vmatpush3.bf16.xpose.msra.mxu1 %v2529_v31  ;;  %v1856_v31 = vld [vmem:[#allocation8 + $0x24] ss:$8 sps:$4 sm:$0xff]  }
 0x3af   : > { %v476_v35 = vpop.f32.mrb[0].mxu1 }
 0x3b0   : > { %v483_v36 = vadd.f32 %v476_v35, %v365_v1  ;;  %v1709_v37 = vpop.f32.mrb[1].mxu1  ;;  %v1859_v35 = vld [vmem:[#allocation8 + $0x34] ss:$8 sps:$4 sm:$0xff]  }
 0x3b1   : > { %v479_v39 = vpop.f32.mrb[2].mxu1  ;;  %v1862_v37 = vld [vmem:[#allocation8 + $0x44] ss:$8 sps:$4 sm:$0xff]  }
 0x3b2   : > { %485 = vst [vmem:[#allocation2 + $0x8] sm:$0xff] %v483_v36  ;;  %v490_v40 = vrot.slane %v483_v36, %v2532_v34  ;;  %v484_v41 = vadd.f32 %v479_v39, %v366_v2  ;;  %v1710_v42 = vpop.f32.mrb[3].mxu1  ;;  %v1860_v39 = vld [vmem:[#allocation8 + $0x40] ss:$8 sps:$4 sm:$0xff]  }
 0x3b3   : > { %v1868_v42 = vld [vmem:[#allocation8 + $0x64] ss:$8 sps:$4 sm:$0xff]  }
 0x3b4   : > { %491 = vst [vmem:[#allocation2 + $0x6] sm:$0x3] %v490_v40  ;;  %486 = vst [vmem:[#allocation2 + $0x10] sm:$0xff] %v484_v41  ;;  %v495_v43 = vrot.slane %v484_v41, %v2534_v38  ;;  %v1865_v40 = vld [vmem:[#allocation8 + $0x54] ss:$8 sps:$4 sm:$0xff]  }
 0x3b6   : > { %496 = vst [vmem:[#allocation2 + $0x18] sm:$0x3] %v495_v43  ;;  %v1866_v43 = vld [vmem:[#allocation8 + $0x60] ss:$8 sps:$4 sm:$0xff]  }
 0x3bb   : > { %v497_v44 = vld [vmem:[#allocation2 + $0x6] sm:$0xff]  ;;  %v498_v46 = vld [vmem:[#allocation2 + $0xe] sm:$0xff] }
 0x3bc   : > { %v499_v45 = vld [vmem:[#allocation2 + $0x7] sm:$0xff]  ;;  %v500_v47 = vld [vmem:[#allocation2 + $0xf] sm:$0xff] }
 0x3bd   : > { %v503_v48 = vld [vmem:[#allocation2 + $0x9] sm:$0xff]  ;;  %v507_v49 = vadd.f32 %v499_v45, %v497_v44  ;;  %v504_v50 = vld [vmem:[#allocation2 + $0x11] sm:$0xff]  ;;  %v508_v52 = vadd.f32 %v500_v47, %v498_v46  ;;  %v2195_v46 = vmov 0  }
 0x3be   : > { %v509_v51 = vadd.f32 %v503_v48, %v483_v36  ;;  %v510_v53 = vadd.f32 %v504_v50, %v484_v41  ;;  %v505_v56 = vld [vmem:[#allocation2 + $0xa] sm:$0xff]  ;;  %v506_v57 = vld [vmem:[#allocation2 + $0x12] sm:$0xff]  ;;  %v1875_v50 = vld [vmem:[#allocation9 + $0x8] sm:$0xff]  }
 0x3bf   : > { %v1871_v44 = vld [vmem:[#allocation8 + $0x74] ss:$8 sps:$4 sm:$0xff]   ;;  %v1869_v45 = vld [vmem:[#allocation8 + $0x70] ss:$8 sps:$4 sm:$0xff]   ;;  %v1872_v47 = vld [vmem:[#allocation9 + $0x40] sm:$0xff]  }
 0x3c0   : > { %v511_v54 = vadd.f32 %v509_v51, %v507_v49  ;;  %v512_v55 = vadd.f32 %v510_v53, %v508_v52  ;;  %v1873_v48 = vld [vmem:[#allocation9] sm:$0xff]   ;;  %v1874_v49 = vld [vmem:[#allocation9 + $0x48] sm:$0xff]   ;;  %1646 = vmatprep.subr.bf16.mxu1 %v1872_v47  ;;  %v1876_v51 = vld [vmem:[#allocation9 + $0x50] sm:$0xff]  }
 0x3c1   : > { %v1877_v52 = vld [vmem:[#allocation9 + $0x10] sm:$0xff]   ;;  %v1878_v53 = vld [vmem:[#allocation9 + $0x58] sm:$0xff]  }
 0x3c2   : > { %v513_v58 = vadd.f32 %v511_v54, %v505_v56  ;;  %v514_v59 = vadd.f32 %v512_v55, %v506_v57  ;;  %v1879_v54 = vld [vmem:[#allocation9 + $0x18] sm:$0xff]   ;;  %v1880_v55 = vld [vmem:[#allocation9 + $0x60] sm:$0xff]   ;;  %v1882_v57 = vld [vmem:[#allocation9 + $0x68] sm:$0xff]  }
 0x3c3   : > { %v1881_v56 = vld [vmem:[#allocation9 + $0x20] sm:$0xff]   ;;  %v1894_v47 = vld [vmem:[#allocation11 + $0x50] sm:$0xff]  }
 0x3c4   : > { %v515_v60 = vmul.f32 0.2, %v513_v58  ;;  %v516_v61 = vmul.f32 0.2, %v514_v59  ;;  %v1883_v58 = vld [vmem:[#allocation9 + $0x28] sm:$0xff]  }
 0x3c6   : > { %v2538_v62 = vsub.f32 %v483_v36, %v515_v60  ;;  %v2540_v63 = vsub.f32 %v484_v41, %v516_v61  ;;  %v1857_v36 = vld [vmem:[#allocation8 + $0x30] ss:$8 sps:$4 sm:$0xff]  }
 0x3c7   : > { %v1863_v41 = vld [vmem:[#allocation8 + $0x50] ss:$8 sps:$4 sm:$0xff]  }
 0x3c8   : > { %v520_v1 = vmul.f32 0.088388346, %v2540_v63  ;;  %v519_v2 = vmul.f32 0.088388346, %v2538_v62 }
 0x3ca   : > { %v521_v3 = vpack.c.bf16 %v520_v1, %v519_v2 }
 0x3cc   : > { %1716 = vmatmul.mubr.bf16.vlgmr.msra.gmra.mrb[4].mxu1 %v521_v3 }
 0x3cd   : > { %1647 = vmatpush3.bf16.msra.mxu1 %v1873_v48  ;;  %v1895_v48 = vld [vmem:[#allocation11 + $0x90] sm:$0xff]  }
 0x3ce   : > { %1648 = vmatprep.subr.bf16.mxu1 %v1874_v49  ;;  %v1896_v49 = vld [vmem:[#allocation11 + $0x10] sm:$0xff]  }
 0x3d1   : > { %1649 = vmatpush3.bf16.msra.mxu1 %v1875_v50  ;;  %v1897_v50 = vld [vmem:[#allocation11 + $0x58] sm:$0xff]  }
 0x3d2   : > { %1650 = vmatprep.subr.bf16.mxu1 %v1876_v51  ;;  %v1898_v51 = vld [vmem:[#allocation11 + $0x98] sm:$0xff]  }
 0x3d5   : > { %1651 = vmatpush3.bf16.msra.mxu1 %v1877_v52  ;;  %v1899_v52 = vld [vmem:[#allocation11 + $0x18] sm:$0xff]  }
 0x3d6   : > { %1652 = vmatprep.subr.bf16.mxu1 %v1878_v53  ;;  %v1900_v53 = vld [vmem:[#allocation11 + $0x60] sm:$0xff]  }
 0x3d9   : > { %1653 = vmatpush3.bf16.msra.mxu1 %v1879_v54  ;;  %v1901_v54 = vld [vmem:[#allocation11 + $0xa0] sm:$0xff]  }
 0x3da   : > { %1654 = vmatprep.subr.bf16.mxu1 %v1880_v55  ;;  %v1902_v55 = vld [vmem:[#allocation11 + $0x20] sm:$0xff]  }
 0x3dd   : > { %1655 = vmatpush3.bf16.msra.mxu1 %v1881_v56  ;;  %v1903_v56 = vld [vmem:[#allocation11 + $0x68] sm:$0xff]  }
 0x3de   : > { %1656 = vmatprep.subr.bf16.mxu1 %v1882_v57  ;;  %v1904_v57 = vld [vmem:[#allocation11 + $0xa8] sm:$0xff]  }
 0x3e1   : > { %1657 = vmatpush3.bf16.msra.mxu1 %v1883_v58  ;;  %v1905_v58 = vld [vmem:[#allocation11 + $0x28] sm:$0xff]  }
 0x49f   : > { %v566_v4 = vpop.f32.mrb[4].mxu1 }
 0x4a0   : > { %v1717_v5 = vpop.f32.mrb[5].mxu1  ;;  %v574_v6 = vsel %vm573_vm2, %v566_v4, -inf }
 0x4a1   : > { %575 = vmax.xlane.f32.xlu0 %v574_v6  ;;  %v569_v7 = vpop.f32.mrb[6].mxu1 }
 0x4a2   : > { %v1718_v8 = vpop.f32.mrb[7].mxu1  ;;  %v577_v9 = vsel %vm573_vm2, %v569_v7, -inf }
 0x4a3   : > { %578 = vmax.xlane.f32.xlu1 %v577_v9 }
 0x52e   : > { %v576_v10 = vpop.xlane.xlu0 %575 }
 0x52f   : > { %v580_v11 = vsub.f32 %v566_v4, %v576_v10 }
 0x530   : > { %v579_v12 = vpop.xlane.xlu1 %578 }
 0x531   : > { %v582_v13 = vmul.f32 1.442695, %v580_v11  ;;  %v581_v14 = vsub.f32 %v569_v7, %v579_v12 }
 0x533   : > { %1920 = vpow2.f32 %v582_v13  ;;  %v584_v15 = vmul.f32 1.442695, %v581_v14 }
 0x535   : > { %1922 = vpow2.f32 %v584_v15 }
 0x53d   : > { %v1921_v16 = vpop.eup %1920 }
 0x53e   : > { %v586_v17 = vsel %vm573_vm2, %v1921_v16, 0.0 }
 0x53f   : > { %v1923_v18 = vpop.eup %1922  ;;  %587 = vadd.xlane.f32.xlu0 %v586_v17 }
 0x540   : > { %v589_v19 = vsel %vm573_vm2, %v1923_v18, 0.0 }
 0x541   : > { %590 = vadd.xlane.f32.xlu1 %v589_v19 }
 0x5cc   : > { %v588_v22 = vpop.xlane.xlu0 %587 }
 0x5cd   : > { %1924 = vrcp.f32 %v588_v22 }
 0x5ce   : > { %v591_v23 = vpop.xlane.xlu1 %590 }
 0x5cf   : > { %1926 = vrcp.f32 %v591_v23 }
 0x5d7   : > { %v1925_v24 = vpop.eup %1924 }
 0x5d8   : > { %v594_v26 = vmul.f32 %v1925_v24, %v1921_v16 }
 0x5d9   : > { %v1927_v25 = vpop.eup %1926 }
 0x5da   : > { %v595_v27 = vmul.f32 %v1927_v25, %v1923_v18  ;;  %v1884_v25 = vld [vmem:[#allocation9 + $0x70] sm:$0xff]  }
 0x5db   : > { %1658 = vmatprep.subr.bf16.mxu1 %v1884_v25 }
 0x5dc   : > { %v596_v29 = vpack.c.bf16 %v595_v27, %v594_v26  ;;  %v1885_v26 = vld [vmem:[#allocation9 + $0x30] sm:$0xff]   ;;  %v1886_v27 = vld [vmem:[#allocation9 + $0x78] sm:$0xff]  }
 0x5dd   : > { %1659 = vmatpush3.bf16.msra.mxu1 %v1885_v26 }
 0x5de   : > { %1724 = vmatmul.mubr.msk.bf16.vlgmr.msra.gmra.mrb[4].mxu0 %vm573_vm2, %v596_v29  ;;  %1660 = vmatprep.subr.bf16.mxu1 %v1886_v27 }
 0x5df   : > { %779 = vmatpush1.bf16.msra.mxu0 %v1848_v28  ;;  %810 = vmatprep.mubr.bf16.mxu0 %v2195_v46  ;;  %v1887_v28 = vld [vmem:[#allocation9 + $0x38] sm:$0xff]   ;;  %v1893_v46 = vld [vmem:[#allocation11 + $0x8] sm:$0xff]  }
 0x5e0   : > { %780 = vmatprep.subr.bf16.mxu0 %v1853_v30 }
 0x5e1   : > { %1661 = vmatpush3.bf16.msra.mxu1 %v1887_v28 }
 0x5e2   : > { %1727 = vmatprep.subr.bf16.mxu1 %v2193_v0 }
 0x5e3   : > { %781 = vmatpush1.bf16.msra.mxu0 %v1851_v32 }
 0x5e4   : > { %782 = vmatprep.subr.bf16.mxu0 %v1856_v31 }
 0x5e7   : > { %783 = vmatpush1.bf16.msra.mxu0 %v1854_v33 }
 0x5e8   : > { %784 = vmatprep.subr.bf16.mxu0 %v1859_v35 }
 0x5eb   : > { %785 = vmatpush1.bf16.msra.mxu0 %v1857_v36 }
 0x5ec   : > { %786 = vmatprep.subr.bf16.mxu0 %v1862_v37 }
 0x5ef   : > { %787 = vmatpush1.bf16.msra.mxu0 %v1860_v39 }
 0x5f0   : > { %788 = vmatprep.subr.bf16.mxu0 %v1865_v40 }
 0x5f3   : > { %789 = vmatpush1.bf16.msra.mxu0 %v1863_v41  ;;  %v1888_v41 = vld [vmem:[#allocation11 + $0x40] sm:$0xff]  }
 0x5f4   : > { %790 = vmatprep.subr.bf16.mxu0 %v1868_v42  ;;  %v1889_v42 = vld [vmem:[#allocation11 + $0x80] sm:$0xff]  }
 0x5f7   : > { %791 = vmatpush1.bf16.msra.mxu0 %v1866_v43  ;;  %v1890_v43 = vld [vmem:[#allocation11] sm:$0xff]  }
 0x5f8   : > { %792 = vmatprep.subr.bf16.mxu0 %v1871_v44  ;;  %v1891_v44 = vld [vmem:[#allocation11 + $0x48] sm:$0xff]  }
 0x5fb   : > { %793 = vmatpush1.bf16.msra.mxu0 %v1869_v45  ;;  %v1892_v45 = vld [vmem:[#allocation11 + $0x88] sm:$0xff]  }
 0x5fc   : > { %1668 = vmatprep.subr.bf16.mxu0 %v1888_v41 }
 0x6b1   : > { %v638_v59 = vpop.f32.mrb[4].mxu0 }
 0x6b2   : > { %v645_v60 = vadd.f32 %v638_v59, %v2538_v62  ;;  %v1725_v61 = vpop.f32.mrb[5].mxu0  ;;  %v1906_v59 = vld [vmem:[#allocation11 + $0x70] sm:$0xff]  }
 0x6b3   : > { %v641_v1 = vpop.f32.mrb[6].mxu0  ;;  %v1908_v61 = vld [vmem:[#allocation11 + $0x30] sm:$0xff]  }
 0x6b4   : > { %v652_v2 = vrot.slane %v645_v60, %v2532_v34  ;;  %647 = vst [vmem:[#allocation2 + $0x8] sm:$0xff] %v645_v60  ;;  %v646_v3 = vadd.f32 %v641_v1, %v2540_v63  ;;  %v1726_v4 = vpop.f32.mrb[7].mxu0  ;;  %v1909_v1 = vld [vmem:[#allocation11 + $0x78] sm:$0xff]  }
 0x6b6   : > { %653 = vst [vmem:[#allocation2 + $0x6] sm:$0x3] %v652_v2  ;;  %648 = vst [vmem:[#allocation2 + $0x10] sm:$0xff] %v646_v3  ;;  %v657_v5 = vrot.slane %v646_v3, %v2534_v38  ;;  %v1910_v2 = vld [vmem:[#allocation11 + $0xb8] sm:$0xff]  }
 0x6b8   : > { %658 = vst [vmem:[#allocation2 + $0x18] sm:$0x3] %v657_v5 }
 0x6bd   : > { %v659_v6 = vld [vmem:[#allocation2 + $0x6] sm:$0xff]  ;;  %v660_v7 = vld [vmem:[#allocation2 + $0xe] sm:$0xff] }
 0x6be   : > { %v661_v8 = vld [vmem:[#allocation2 + $0x7] sm:$0xff]  ;;  %v662_v9 = vld [vmem:[#allocation2 + $0xf] sm:$0xff] }
 0x6bf   : > { %v665_v10 = vld [vmem:[#allocation2 + $0x9] sm:$0xff]  ;;  %v669_v11 = vadd.f32 %v661_v8, %v659_v6  ;;  %v666_v62 = vld [vmem:[#allocation2 + $0x11] sm:$0xff]  ;;  %v670_v13 = vadd.f32 %v662_v9, %v660_v7 }
 0x6c0   : > { %v671_v12 = vadd.f32 %v665_v10, %v645_v60  ;;  %v672_v14 = vadd.f32 %v666_v62, %v646_v3  ;;  %v667_v16 = vld [vmem:[#allocation2 + $0xa] sm:$0xff]  ;;  %v668_v63 = vld [vmem:[#allocation2 + $0x12] sm:$0xff] }
 0x6c2   : > { %v673_v15 = vadd.f32 %v671_v12, %v669_v11  ;;  %v674_v17 = vadd.f32 %v672_v14, %v670_v13 }
 0x6c4   : > { %v675_v18 = vadd.f32 %v673_v15, %v667_v16  ;;  %v676_v19 = vadd.f32 %v674_v17, %v668_v63 }
 0x6c6   : > { %v677_v20 = vmul.f32 0.2, %v675_v18  ;;  %v678_v21 = vmul.f32 0.2, %v676_v19 }
 0x6c8   : > { %v2554_v22 = vsub.f32 %v645_v60, %v677_v20  ;;  %v2556_v23 = vsub.f32 %v646_v3, %v678_v21  ;;  %v1907_v60 = vld [vmem:[#allocation11 + $0xb0] sm:$0xff]   ;;  %v1911_v3 = vld [vmem:[#allocation11 + $0x38] sm:$0xff]  }
 0x6ca   : > { %v681_v24 = vpack.c.bf16 %v2556_v23, %v2554_v22 }
 0x6cc   : > { %811 = vmatmul.mubr.bf16.vlgmr.msra.gmra.mrb[8].mxu0 %v681_v24 }
 0x6cd   : > { %1669 = vmatpush3.bf16.msra.mxu0 %v1890_v43 }
 0x6ce   : > { %1670 = vmatprep.subr.bf16.mxu0 %v1891_v44 }
 0x6d1   : > { %1671 = vmatpush3.bf16.msra.mxu0 %v1893_v46 }
 0x6d2   : > { %1672 = vmatprep.subr.bf16.mxu0 %v1894_v47 }
 0x6d5   : > { %1673 = vmatpush3.bf16.msra.mxu0 %v1896_v49 }
 0x6d6   : > { %1674 = vmatprep.subr.bf16.mxu0 %v1897_v50 }
 0x6d9   : > { %1675 = vmatpush3.bf16.msra.mxu0 %v1899_v52 }
 0x6da   : > { %1676 = vmatprep.subr.bf16.mxu0 %v1900_v53 }
 0x6dd   : > { %1677 = vmatpush3.bf16.msra.mxu0 %v1902_v55 }
 0x6de   : > { %1678 = vmatprep.subr.bf16.mxu0 %v1903_v56 }
 0x6e1   : > { %1679 = vmatpush3.bf16.msra.mxu0 %v1905_v58 }
 0x6e2   : > { %1680 = vmatprep.subr.bf16.mxu0 %v1906_v59 }
 0x6e5   : > { %1681 = vmatpush3.bf16.msra.mxu0 %v1908_v61 }
 0x6e6   : > { %1682 = vmatprep.subr.bf16.mxu0 %v1909_v1 }
 0x6e9   : > { %1683 = vmatpush3.bf16.msra.mxu0 %v1911_v3 }
 0x79f   : > { %v812_v29 = vpop.f32.mrb[8].mxu0 }
 0x7a0   : > { %v814_v30 = vpop.f32.mrb[9].mxu0  ;;  %v821_v31 = vmax.f32 %v812_v29, 0.0 }
 0x7a1   : > { %v816_v32 = vpop.f32.mrb[10].mxu0  ;;  %v822_v36 = vmax.f32 %v814_v30, 0.0 }
 0x7a2   : > { %v823_v33 = vmax.f32 %v816_v32, 0.0  ;;  %v818_v35 = vpop.f32.mrb[11].mxu0 }
 0x7a3   : > { %v824_v37 = vmax.f32 %v818_v35, 0.0 }
 0x7a4   : > { %v825_v39 = vpack.c.bf16 %v823_v33, %v821_v31 }
 0x7a5   : > { %v826_v40 = vpack.c.bf16 %v824_v37, %v822_v36 }
 0x7a7   : > { %987 = vmatprep.mubr.bf16.mxu1 %v826_v40 }
 0x7a8   : > { %988 = vmatmul.mubr.bf16.vlgmr.msra.gmra.mrb[8].mxu1 %v825_v39 }
 0x7a9   : > { %1743 = vmatprep.mubr.msk.bf16.mxu1 %vm2194_vm0, %v2193_v0  ;;  %1728 = vmatpush3.bf16.msra.mxu1 %v1889_v42 }
 0x7aa   : > { %1729 = vmatprep.subr.bf16.mxu1 %v2193_v0 }
 0x7ad   : > { %1730 = vmatpush3.bf16.msra.mxu1 %v1892_v45 }
 0x7ae   : > { %1731 = vmatprep.subr.bf16.mxu1 %v2193_v0 }
 0x7b1   : > { %1732 = vmatpush3.bf16.msra.mxu1 %v1895_v48 }
 0x7b2   : > { %1733 = vmatprep.subr.bf16.mxu1 %v2193_v0 }
 0x7b5   : > { %1734 = vmatpush3.bf16.msra.mxu1 %v1898_v51 }
 0x7b6   : > { %1735 = vmatprep.subr.bf16.mxu1 %v2193_v0 }
 0x7b9   : > { %1736 = vmatpush3.bf16.msra.mxu1 %v1901_v54 }
 0x7ba   : > { %1737 = vmatprep.subr.bf16.mxu1 %v2193_v0 }
 0x7bd   : > { %1738 = vmatpush3.bf16.msra.mxu1 %v1904_v57 }
 0x7be   : > { %1739 = vmatprep.subr.bf16.mxu1 %v2193_v0 }
 0x7c1   : > { %1740 = vmatpush3.bf16.msra.mxu1 %v1907_v60 }
 0x7c2   : > { %1741 = vmatprep.subr.bf16.mxu1 %v2193_v0 }
 0x7c5   : > { %1742 = vmatpush3.bf16.msra.mxu1 %v1910_v2 }
 0x87b   : > { %v1662_v4 = vpop.f32.mrb[8].mxu1 }
 0x87c   : > { %v1663_v5 = vpop.f32.mrb[9].mxu1 }
 0x87d   : > { %v1664_v6 = vadd.f32 %v1663_v5, %v1662_v4  ;;  %v1665_v7 = vpop.f32.mrb[10].mxu1 }
 0x87e   : > { %v1666_v8 = vpop.f32.mrb[11].mxu1 }
 0x87f   : > { %v996_v9 = vadd.f32 %v1664_v6, %v2554_v22  ;;  %v1667_v10 = vadd.f32 %v1666_v8, %v1665_v7 }
 0x881   : > { %998 = vst [vmem:[#allocation2 + $0x8] sm:$0xff] %v996_v9  ;;  %v1003_v11 = vrot.slane %v996_v9, %v2532_v34  ;;  %v997_v62 = vadd.f32 %v1667_v10, %v2556_v23 }
 0x883   : > { %1004 = vst [vmem:[#allocation2 + $0x6] sm:$0x3] %v1003_v11  ;;  %999 = vst [vmem:[#allocation2 + $0x10] sm:$0xff] %v997_v62  ;;  %v1008_v0 = vrot.slane %v997_v62, %v2534_v38 }
 0x885   : > { %1009 = vst [vmem:[#allocation2 + $0x18] sm:$0x3] %v1008_v0 }
 0x88a   : > { %v1010_v12 = vld [vmem:[#allocation2 + $0x6] sm:$0xff]  ;;  %v1011_v14 = vld [vmem:[#allocation2 + $0xe] sm:$0xff] }
 0x88b   : > { %v1012_v13 = vld [vmem:[#allocation2 + $0x7] sm:$0xff]  ;;  %v1013_v16 = vld [vmem:[#allocation2 + $0xf] sm:$0xff] }
 0x88c   : > { %v1020_v15 = vadd.f32 %v1012_v13, %v1010_v12  ;;  %v1016_v17 = vld [vmem:[#allocation2 + $0x9] sm:$0xff]  ;;  %v1017_v63 = vld [vmem:[#allocation2 + $0x11] sm:$0xff]  ;;  %v1021_v19 = vadd.f32 %v1013_v16, %v1011_v14 }
 0x88d   : > { %v1022_v18 = vadd.f32 %v1016_v17, %v996_v9  ;;  %v1023_v20 = vadd.f32 %v1017_v63, %v997_v62  ;;  %v1018_v22 = vld [vmem:[#allocation2 + $0xa] sm:$0xff]  ;;  %v1019_v23 = vld [vmem:[#allocation2 + $0x12] sm:$0xff] }
 0x88f   : > { %v1024_v21 = vadd.f32 %v1022_v18, %v1020_v15  ;;  %v1025_v24 = vadd.f32 %v1023_v20, %v1021_v19 }
 0x891   : > { %v1026_v25 = vadd.f32 %v1024_v21, %v1018_v22  ;;  %v1027_v26 = vadd.f32 %v1025_v24, %v1019_v23 }
 0x893   : > { %v1028_v27 = vmul.f32 0.2, %v1026_v25  ;;  %v1029_v28 = vmul.f32 0.2, %v1027_v26 }
 0x895   : > { %v1030_v29 = vsub.f32 %v996_v9, %v1028_v27  ;;  %v1031_v30 = vsub.f32 %v997_v62, %v1029_v28 }
 0x897   : > { %1034 = vst [vmem:[#allocation2 + $0x8] sm:$0xff] %v1030_v29  ;;  %v1039_v32 = vrot.slane %v1030_v29, %v2532_v34  ;;  %1032 = vst [vmem:[%s2576_s27] sm:$0xff] %v1030_v29  ;;  %v1044_v31 = vrot.slane %v1031_v30, %v2534_v38 }
 0x898   : > { %1033 = vst [vmem:[%s2576_s27 + $0x8] sm:$0xff] %v1031_v30  ;;  %1035 = vst [vmem:[#allocation2 + $0x10] sm:$0xff] %v1031_v30 }
 0x899   : > { %1040 = vst [vmem:[#allocation2 + $0x6] sm:$0x3] %v1039_v32  ;;  %1045 = vst [vmem:[#allocation2 + $0x18] sm:$0x3] %v1044_v31 }
 0x89f   : > { %v1047_v33 = vld [vmem:[#allocation2 + $0xe] sm:$0xff] }
 0x8a0   : > { %v1049_v35 = vld [vmem:[#allocation2 + $0xf] sm:$0xff]  ;;  %v1046_v37 = vld [vmem:[#allocation2 + $0x6] sm:$0xff] }
 0x8a1   : > { %v1052_v36 = vld [vmem:[#allocation2 + $0x9] sm:$0xff]  ;;  %v1053_v41 = vld [vmem:[#allocation2 + $0x11] sm:$0xff]  ;;  %v1057_v34 = vadd.f32 %v1049_v35, %v1047_v33 }
 0x8a2   : > { %v1048_v39 = vld [vmem:[#allocation2 + $0x7] sm:$0xff]  ;;  %v1058_v40 = vadd.f32 %v1052_v36, %v1030_v29  ;;  %v1059_v43 = vadd.f32 %v1053_v41, %v1031_v30  ;;  %v1055_v47 = vld [vmem:[#allocation2 + $0x12] sm:$0xff] }
 0x8a3   : > { %v1056_v42 = vadd.f32 %v1048_v39, %v1046_v37  ;;  %v1054_v45 = vld [vmem:[#allocation2 + $0xa] sm:$0xff] }
 0x8a4   : > { %v1061_v46 = vadd.f32 %v1059_v43, %v1057_v34 }
 0x8a5   : > { %v1060_v44 = vadd.f32 %v1058_v40, %v1056_v42 }
 0x8a6   : > { %v1063_v49 = vadd.f32 %v1061_v46, %v1055_v47 }
 0x8a7   : > { %v1062_v48 = vadd.f32 %v1060_v44, %v1054_v45 }
 0x8a8   : > { %v1065_v38 = vmul.f32 0.2, %v1063_v49 }
 0x8a9   : > { %v1064_v50 = vmul.f32 0.2, %v1062_v48 }
 0x8aa   : > { %v1067_v52 = vmul.f32 3.0, %v1065_v38 }
 0x8ab   : > { %v1066_v51 = vmul.f32 3.0, %v1064_v50 }
 0x8ac   : > { %1069 = vst [vmem:[#allocation2 + $0x10] sm:$0xff] %v1067_v52  ;;  %1070 = vst [vmem:[#allocation2] sm:$0x80] %v1067_v52 }
 0x8ad   : > { %1068 = vst [vmem:[#allocation2 + $0x8] sm:$0xff] %v1066_v51  ;;  %1071 = vst [vmem:[#allocation2 + $0x18] sm:$0x1] %v1066_v51  ;;  %v1079_v53 = vpack.c.bf16 %v1067_v52, %v1066_v51 }
 0x8af   : > { %1305 = vmatprep.mubr.bf16.mxu0 %v1079_v53 }
 0x8b4   : > { %v1076_v54 = vld [vmem:[#allocation2 + $0x9] sm:$0xff]  ;;  %v1077_v55 = vld [vmem:[#allocation2 + $0x11] sm:$0xff] }
 0x8b5   : > { %v1072_v56 = vld [vmem:[#allocation2 + $0x7] sm:$0xff]  ;;  %v1080_v57 = vpack.c.bf16 %v1077_v55, %v1076_v54  ;;  %v1073_v58 = vld [vmem:[#allocation2 + $0xf] sm:$0xff] }
 0x8b6   : > { %v1078_v59 = vpack.c.bf16 %v1073_v58, %v1072_v56 }
 0x8b7   : > { %1744 = vmatmul.mubr.bf16.vlgmr.msra.gmra.mrb[12].mxu1 %v1080_v57 }
 0x8b8   : > { %1306 = vmatmul.mubr.bf16.vlgmr.msra.gmra.mrb[12].mxu0 %v1078_v59 }
 0x8b9   : > { %2085 = shalt.err (!%p2082_p3)
}
 0x8ba   : > { %s2086_s2 = scalar_lea.hbm %s2587_s8, 256  ;;  %s2090_s29 = scalar_lea.hbm %s2679_s5, 512 }
 0x8bb   : > { %p2087_p9 = scmp.ne.s32.totalorder %s2587_s8, %s2086_s2  ;;  %p2091_p7 = scmp.lt.u32.totalorder %s2587_s8, %s2679_s5 }
 0x8bc   : > { %p2092_p12 = scmp.lt.u32.totalorder %s2090_s29, %s2086_s2  ;;  %p2094_p2 = scmp.lt.u32.totalorder %s2086_s2, %s2587_s8 }
 0x8bd   : > { %p2088_p13 = pnand %p2087_p9, %p2386_p5 }
 0x8be   : > { %p2093_p1 = por %p2092_p12, %p2091_p7 }
 0x8bf   : > { %p2089_p11 = pneg %p2088_p13 }
 0x8c0   : > { %p2095_p4 = por %p2094_p2, %p2093_p1 }
 0x8c2   : > { %p2096_p0 = pnand %p2095_p4, %p2089_p11 }
 0x8c4   : > { %2099 = shalt.err (!%p2096_p0)
}
 0x8c5   : > { %s2197_s27 = smov 128   ;;  %s2198_s10 = smov 8  }
 0x8c6   : > { %1766 = dma.vmem_to_hbm [thread:$0]  (%p2386_p5), %s2590_s0, 256, %s2587_s8, %s1358_s30, %s2197_s27, %s2197_s27, %s2198_s10  }
 0x8c7   : > { %s363_s16 = scalar_lea.vmem [#allocation13], %s2484_s13  ;;  %s2627_s30 = scalar_lea.hbm %s2680_s6, %s1634_s18 }
 0x8c8   : > { %s1392_s15 = sshll.u32 %s363_s16, 4  ;;  %s1363_s13 = scalar_lea.sflag [#allocation14], %s2481_s19  ;;  %s2620_s15 = int_to_ptr.vmem [resolvable:$true] %s1392_s15 }
 0x8c9   : > { %s2100_s7 = scalar_lea.vmem %s2620_s15, 256  ;;  %s2199_s4 = smov [#allocation13]  }
 0x8ca   : > { %p2101_p8 = scmp.ne.s32.totalorder %s2620_s15, %s2100_s7  ;;  %s2104_s12 = sshll.u32 %s2199_s4, 4  ;;  %s2105_s12 = int_to_ptr.vmem [resolvable:$false] %s2104_s12 }
 0x8cb   : > { %s2106_s2 = scalar_lea.vmem %s2105_s12, 512  ;;  %p2107_p3 = scmp.lt.s32.totalorder %s2620_s15, %s2105_s12 }
 0x8cc   : > { %p2102_p6 = pnand %p2101_p8, %p2386_p5  ;;  %p2108_p9 = scmp.lt.s32.totalorder %s2106_s2, %s2100_s7 }
 0x8ce   : > { %p2103_p10 = pneg %p2102_p6  ;;  %p2109_p13 = por %p2108_p9, %p2107_p3 }
 0x8d0   : > { %p2110_p11 = pnand %p2109_p13, %p2103_p10 }
 0x98a   : > { %v1348_v60 = vpop.f32.mrb[12].mxu1 }
 0x98b   : > { %v1684_v61 = vpop.f32.mrb[12].mxu0  ;;  %v1745_v1 = vpop.f32.mrb[13].mxu1 }
 0x98c   : > { %v1685_v2 = vpop.f32.mrb[13].mxu0  ;;  %v1351_v3 = vpop.f32.mrb[14].mxu1 }
 0x98d   : > { %v1686_v4 = vadd.f32 %v1685_v2, %v1684_v61  ;;  %v1687_v5 = vpop.f32.mrb[14].mxu0  ;;  %v1746_v6 = vpop.f32.mrb[15].mxu1 }
 0x98e   : > { %v1688_v7 = vpop.f32.mrb[15].mxu0 }
 0x98f   : > { %v1349_v8 = vadd.f32 %v1686_v4, %v1348_v60  ;;  %v1689_v9 = vadd.f32 %v1688_v7, %v1687_v5 }
 0x991   : > { %1355 = vst [vmem:[%s363_s16] sm:$0xff] %v1349_v8  ;;  %v1352_v10 = vadd.f32 %v1689_v9, %v1351_v3 }
 0x993   : > { %1356 = vst [vmem:[%s363_s16 + $0x8] sm:$0xff] %v1352_v10 }
 0x994   : > { %2113 = shalt.err (!%p2110_p11)
}
 0x995   : > { %s2114_s25 = scalar_lea.hbm %s2627_s30, 256  ;;  %s2118_s3 = scalar_lea.hbm %s2680_s6, 512 }
 0x996   : > { %p2115_p7 = scmp.ne.s32.totalorder %s2627_s30, %s2114_s25  ;;  %p2119_p2 = scmp.lt.u32.totalorder %s2627_s30, %s2680_s6 }
 0x997   : > { %p2120_p4 = scmp.lt.u32.totalorder %s2118_s3, %s2114_s25  ;;  %p2122_p8 = scmp.lt.u32.totalorder %s2114_s25, %s2627_s30 }
 0x998   : > { %p2116_p12 = pnand %p2115_p7, %p2386_p5 }
 0x999   : > { %p2121_p0 = por %p2120_p4, %p2119_p2 }
 0x99a   : > { %p2117_p1 = pneg %p2116_p12 }
 0x99b   : > { %p2123_p6 = por %p2122_p8, %p2121_p0 }
 0x99d   : > { %p2124_p10 = pnand %p2123_p6, %p2117_p1 }
 0x99f   : > { %2127 = shalt.err (!%p2124_p10)
}
 0x9a0   : > { %1767 = dma.vmem_to_hbm [thread:$0]  (%p2386_p5), %s2620_s15, 256, %s2627_s30, %s1363_s13, %s2197_s27, %s2197_s27, %s2198_s10  }
 0x9a1 PF: > { %s1407_s17 = sand.u32 1, %s2170_s21   ;;  %p2715_p3 = scmp.ne.s32.totalorder %s2693_s28, 0 }
 0x9a2   : > { %p2716_p9 = scmp.ge.s32.totalorder %s2182_s24, 2  ;;  %s1408_s16 = scalar_lea.sflag [#allocation5], %s1407_s17 }
 0x9a4   : > { %p1788_p13 = pnand %p2716_p9, %p2715_p3 }
 0x9a6   : > { %2161 = dma.done.wait (!%p1788_p13), %s1408_s16, 256  }
 0x9a7   : > { %2163 = vsyncadd (!%p1788_p13), %s1408_s16, 4294967040  ;;  %s1417_s9 = scalar_lea.sflag [#allocation14], %s1407_s17 }
 0x9a8   : > { %2165 = dma.done.wait (!%p1788_p13), %s1417_s9, 256  }
 0x9a9   : > { %2167 = vsyncadd (!%p1788_p13), %s1417_s9, 4294967040  ;;  %p27_p5 = scmp.ge.s32.totalorder %s2351_s14, 4   ;;  %s2717_s21 = smov %s2174_s22 }
 0x9aa   : > { %s2718_s22 = smov %s2178_s23  ;;  %s2719_s23 = smov %s2382_s26 }
 0x9ab   : > { %s2720_s24 = smov %s2351_s14  ;;  %29 = sbr.rel (!%p27_p5) target bundleno = 15 (0xf), region = 127 }
 0x9b2   :  { %1422 = vsyncpa [#allocation4], 1 }
 0x9b3   :  { %1424 = vsyncpa [#allocation4 + $0x1], 1 }
 0x9b4   :  { %1425 = vsyncpa [#allocation7], 1 }
 0x9b5   :  { %1427 = vsyncpa [#allocation7 + $0x1], 1 }
 0x9b6   :  { %1428 = vsyncpa [#allocation10], 1 }
 0x9b7   :  { %1429 = vsyncpa [#allocation5], 1 }
 0x9b8   :  { %1431 = vsyncpa [#allocation5 + $0x1], 1 }
 0x9b9   :  { %1432 = vsyncpa [#allocation14], 1 }
 0x9ba   :  { %1434 = vsyncpa [#allocation14 + $0x1], 1 }

</bundles_post_ra>
